<compile_context>
chip_gen: v6e
topology: v6e:2x2x1
jax: 0.10.0
libtpu: 0.0.40
codegen_flags: <defaults>
</compile_context>

<pallas_src>
import jax
import jax.numpy as jnp
from jax.experimental import pallas as pl
from jax.experimental.pallas import tpu as pltpu

EPS = 1e-5
OUT_PAD = 128  # pad the 1-wide output to one full lane register


def _bn_relu(h, gamma, beta):
    # Train-mode BN folded to per-feature scale/shift; precompute is on (1, C).
    mu = jnp.mean(h, axis=0, keepdims=True)
    var = jnp.mean(jnp.square(h - mu), axis=0, keepdims=True)   # biased variance
    scale = gamma * jax.lax.rsqrt(var + EPS)
    shift = beta - mu * scale
    return jnp.maximum(h * scale + shift, 0.0)


def dnet_kernel(x_ref,
                w1_ref, g1_ref, be1_ref,
                w2_ref, g2_ref, be2_ref,
                w3_ref, b3_ref,
                out_ref):
    x = x_ref[...]

    # layer 1: Linear(784 -> 512) [bias cancelled by BN] + BN + ReLU
    h = jnp.dot(x, w1_ref[...].astype(jnp.float32),
                preferred_element_type=jnp.float32)
    h = _bn_relu(h, g1_ref[...], be1_ref[...])

    # layer 2: Linear(512 -> 256) [bias cancelled by BN] + BN + ReLU
    h = jnp.dot(h, w2_ref[...].astype(jnp.float32),
                preferred_element_type=jnp.float32)
    h = _bn_relu(h, g2_ref[...], be2_ref[...])

    # layer 3: Linear(256 -> 1), padded to 128 lanes, + Sigmoid
    logits = jnp.dot(h, w3_ref[...].astype(jnp.float32),
                     preferred_element_type=jnp.float32) + b3_ref[...]
    out_ref[...] = (1.0 / (1.0 + jnp.exp(-logits))).astype(out_ref.dtype)


def dnet_forward(x, params):
    B = x.shape[0]
    args = (x,
            params["w1"], params["g1"], params["be1"],
            params["w2"], params["g2"], params["be2"],
            params["w3p"], params["b3p"])

    flops = 2 * B * (784 * 512 + 512 * 256 + 256 * OUT_PAD)
    bytes_accessed = sum(int(a.size) * a.dtype.itemsize for a in args) + B * OUT_PAD * 4

    # Everything (weights ~1.1 MB in bf16 + tiny activations) fits easily in VMEM,
    # so a single gridless invocation with full-array blocks is used.
    out_padded = pl.pallas_call(
        dnet_kernel,
        out_shape=jax.ShapeDtypeStruct((B, OUT_PAD), jnp.float32),
        in_specs=[pl.BlockSpec(memory_space=pltpu.MemorySpace.VMEM)] * len(args),
        out_specs=pl.BlockSpec(memory_space=pltpu.MemorySpace.VMEM),
        cost_estimate=pl.CostEstimate(
            flops=flops,
            transcendentals=B * OUT_PAD + 512 + 256,  # sigmoid + 2x rsqrt
            bytes_accessed=bytes_accessed),
    )(*args)
    return out_padded[:, :1]


def init_params(key):
    """PyTorch-default init: Linear weight/bias ~ U(-1/sqrt(fan_in), 1/sqrt(fan_in));
    BatchNorm gamma=1, beta=0.  Weights stored bf16 (used by kernel and reference);
    biases / BN affine params stay f32."""
    dims = [(784, 512), (512, 256), (256, 1)]
    keys = jax.random.split(key, 2 * len(dims))
    params = {}
    for i, (fan_in, fan_out) in enumerate(dims):
        bound = 1.0 / (fan_in ** 0.5)
        w = jax.random.uniform(keys[2 * i], (fan_in, fan_out), jnp.float32, -bound, bound)
        b = jax.random.uniform(keys[2 * i + 1], (1, fan_out), jnp.float32, -bound, bound)
        params[f"w{i+1}"] = w.astype(jnp.bfloat16)
        params[f"b{i+1}"] = b
    params["g1"] = jnp.ones((1, 512), jnp.float32)
    params["be1"] = jnp.zeros((1, 512), jnp.float32)
    params["g2"] = jnp.ones((1, 256), jnp.float32)
    params["be2"] = jnp.zeros((1, 256), jnp.float32)
    # Lane-dense padding of the final (256, 1) layer to (256, 128); extra columns
    # are zero and get sliced off in the wrapper.
    params["w3p"] = jnp.zeros((256, OUT_PAD), jnp.bfloat16).at[:, :1].set(params["w3"])
    params["b3p"] = jnp.zeros((1, OUT_PAD), jnp.float32).at[:, :1].set(params["b3"])
    return params


def dnet_reference(x, params):
    """Pure-JAX reference following the PyTorch module exactly (including b1/b2,
    which the kernel drops because train-mode BN cancels them)."""
    h = x @ params["w1"].astype(jnp.float32) + params["b1"]
    mu = h.mean(0, keepdims=True); var = ((h - mu) ** 2).mean(0, keepdims=True)
    h = jnp.maximum((h - mu) / jnp.sqrt(var + EPS) * params["g1"] + params["be1"], 0.0)
    h = h @ params["w2"].astype(jnp.float32) + params["b2"]
    mu = h.mean(0, keepdims=True); var = ((h - mu) ** 2).mean(0, keepdims=True)
    h = jnp.maximum((h - mu) / jnp.sqrt(var + EPS) * params["g2"] + params["be2"], 0.0)
    logits = h @ params["w3"].astype(jnp.float32) + params["b3"]
    return jax.nn.sigmoid(logits)


if __name__ == "__main__":
    key = jax.random.PRNGKey(0)
    k_param, k_x = jax.random.split(key)
    params = init_params(k_param)

    B = 8                           # BatchNorm in train mode needs B > 1
    x = jax.random.normal(k_x, (B, 784), jnp.float32)

    out = dnet_forward(x, params)
    out = jax.block_until_ready(out)

    ref = dnet_reference(x, params)
    assert out.shape == (B, 1), out.shape
    assert bool(jnp.all((out >= 0.0) & (out <= 1.0))), "sigmoid range violated"
    assert jnp.allclose(out, ref, atol=5e-3, rtol=0.0), "mismatch vs reference"

    print("KERNEL_OK")
</pallas_src>

<mosaic_0001>
module attributes {stable_mosaic.version = 11 : i64} {
  func.func @dnet_kernel(%arg0: memref<8x784xf32, #tpu.memory_space<vmem>>, %arg1: memref<784x512xbf16, #tpu.memory_space<vmem>>, %arg2: memref<1x512xf32, #tpu.memory_space<vmem>>, %arg3: memref<1x512xf32, #tpu.memory_space<vmem>>, %arg4: memref<512x256xbf16, #tpu.memory_space<vmem>>, %arg5: memref<1x256xf32, #tpu.memory_space<vmem>>, %arg6: memref<1x256xf32, #tpu.memory_space<vmem>>, %arg7: memref<256x128xbf16, #tpu.memory_space<vmem>>, %arg8: memref<1x128xf32, #tpu.memory_space<vmem>>, %arg9: memref<8x128xf32, #tpu.memory_space<vmem>>) attributes {dimension_semantics = [], scalar_prefetch = 0 : i64, scratch_operands = 0 : i64, tpu.core_type = #tpu.core_type<tc>} {
    %c0 = arith.constant 0 : index
    %c0_0 = arith.constant 0 : index
    %0 = vector.load %arg0[%c0, %c0_0] : memref<8x784xf32, #tpu.memory_space<vmem>>, vector<8x784xf32>
    %c0_1 = arith.constant 0 : index
    %c0_2 = arith.constant 0 : index
    %1 = vector.load %arg1[%c0_1, %c0_2] : memref<784x512xbf16, #tpu.memory_space<vmem>>, vector<784x512xbf16>
    %2 = arith.extf %1 : vector<784x512xbf16> to vector<784x512xf32>
    %cst = arith.constant dense<0.000000e+00> : vector<8x512xf32>
    %3 = tpu.matmul %0, %2, %cst {dimension_numbers = #tpu.dot_dimension_numbers<[1], [0], [0], [1], [0, 0, 1, 1], [], []>} : vector<8x784xf32>, vector<784x512xf32>, vector<8x512xf32> -> vector<8x512xf32>
    %c0_3 = arith.constant 0 : index
    %c0_4 = arith.constant 0 : index
    %4 = vector.load %arg2[%c0_3, %c0_4] : memref<1x512xf32, #tpu.memory_space<vmem>>, vector<1x512xf32>
    %c0_5 = arith.constant 0 : index
    %c0_6 = arith.constant 0 : index
    %5 = vector.load %arg3[%c0_5, %c0_6] : memref<1x512xf32, #tpu.memory_space<vmem>>, vector<1x512xf32>
    %cst_7 = arith.constant dense<0.000000e+00> : vector<512xf32>
    %6 = vector.multi_reduction <add>, %3, %cst_7 [0] : vector<8x512xf32> to vector<512xf32>
    %7 = vector.shape_cast %6 : vector<512xf32> to vector<1x512xf32>
    %cst_8 = arith.constant 8.000000e+00 : f32
    %8 = vector.broadcast %cst_8 : f32 to vector<1x512xf32>
    %9 = arith.divf %7, %8 : vector<1x512xf32>
    %10 = vector.broadcast %9 : vector<1x512xf32> to vector<8x512xf32>
    %11 = arith.subf %3, %10 : vector<8x512xf32>
    %12 = arith.mulf %11, %11 : vector<8x512xf32>
    %cst_9 = arith.constant dense<0.000000e+00> : vector<512xf32>
    %13 = vector.multi_reduction <add>, %12, %cst_9 [0] : vector<8x512xf32> to vector<512xf32>
    %14 = vector.shape_cast %13 : vector<512xf32> to vector<1x512xf32>
    %cst_10 = arith.constant 8.000000e+00 : f32
    %15 = vector.broadcast %cst_10 : f32 to vector<1x512xf32>
    %16 = arith.divf %14, %15 : vector<1x512xf32>
    %cst_11 = arith.constant 9.99999974E-6 : f32
    %17 = vector.broadcast %cst_11 : f32 to vector<1x512xf32>
    %18 = arith.addf %16, %17 : vector<1x512xf32>
    %19 = math.rsqrt %18 : vector<1x512xf32>
    %20 = arith.mulf %4, %19 : vector<1x512xf32>
    %21 = arith.mulf %9, %20 : vector<1x512xf32>
    %22 = arith.subf %5, %21 : vector<1x512xf32>
    %23 = vector.broadcast %20 : vector<1x512xf32> to vector<8x512xf32>
    %24 = arith.mulf %3, %23 : vector<8x512xf32>
    %25 = vector.broadcast %22 : vector<1x512xf32> to vector<8x512xf32>
    %26 = arith.addf %24, %25 : vector<8x512xf32>
    %cst_12 = arith.constant 0.000000e+00 : f32
    %27 = vector.broadcast %cst_12 : f32 to vector<8x512xf32>
    %28 = arith.maximumf %26, %27 : vector<8x512xf32>
    %c0_13 = arith.constant 0 : index
    %c0_14 = arith.constant 0 : index
    %29 = vector.load %arg4[%c0_13, %c0_14] : memref<512x256xbf16, #tpu.memory_space<vmem>>, vector<512x256xbf16>
    %30 = arith.extf %29 : vector<512x256xbf16> to vector<512x256xf32>
    %cst_15 = arith.constant dense<0.000000e+00> : vector<8x256xf32>
    %31 = tpu.matmul %28, %30, %cst_15 {dimension_numbers = #tpu.dot_dimension_numbers<[1], [0], [0], [1], [0, 0, 1, 1], [], []>} : vector<8x512xf32>, vector<512x256xf32>, vector<8x256xf32> -> vector<8x256xf32>
    %c0_16 = arith.constant 0 : index
    %c0_17 = arith.constant 0 : index
    %32 = vector.load %arg5[%c0_16, %c0_17] : memref<1x256xf32, #tpu.memory_space<vmem>>, vector<1x256xf32>
    %c0_18 = arith.constant 0 : index
    %c0_19 = arith.constant 0 : index
    %33 = vector.load %arg6[%c0_18, %c0_19] : memref<1x256xf32, #tpu.memory_space<vmem>>, vector<1x256xf32>
    %cst_20 = arith.constant dense<0.000000e+00> : vector<256xf32>
    %34 = vector.multi_reduction <add>, %31, %cst_20 [0] : vector<8x256xf32> to vector<256xf32>
    %35 = vector.shape_cast %34 : vector<256xf32> to vector<1x256xf32>
    %cst_21 = arith.constant 8.000000e+00 : f32
    %36 = vector.broadcast %cst_21 : f32 to vector<1x256xf32>
    %37 = arith.divf %35, %36 : vector<1x256xf32>
    %38 = vector.broadcast %37 : vector<1x256xf32> to vector<8x256xf32>
    %39 = arith.subf %31, %38 : vector<8x256xf32>
    %40 = arith.mulf %39, %39 : vector<8x256xf32>
    %cst_22 = arith.constant dense<0.000000e+00> : vector<256xf32>
    %41 = vector.multi_reduction <add>, %40, %cst_22 [0] : vector<8x256xf32> to vector<256xf32>
    %42 = vector.shape_cast %41 : vector<256xf32> to vector<1x256xf32>
    %cst_23 = arith.constant 8.000000e+00 : f32
    %43 = vector.broadcast %cst_23 : f32 to vector<1x256xf32>
    %44 = arith.divf %42, %43 : vector<1x256xf32>
    %cst_24 = arith.constant 9.99999974E-6 : f32
    %45 = vector.broadcast %cst_24 : f32 to vector<1x256xf32>
    %46 = arith.addf %44, %45 : vector<1x256xf32>
    %47 = math.rsqrt %46 : vector<1x256xf32>
    %48 = arith.mulf %32, %47 : vector<1x256xf32>
    %49 = arith.mulf %37, %48 : vector<1x256xf32>
    %50 = arith.subf %33, %49 : vector<1x256xf32>
    %51 = vector.broadcast %48 : vector<1x256xf32> to vector<8x256xf32>
    %52 = arith.mulf %31, %51 : vector<8x256xf32>
    %53 = vector.broadcast %50 : vector<1x256xf32> to vector<8x256xf32>
    %54 = arith.addf %52, %53 : vector<8x256xf32>
    %cst_25 = arith.constant 0.000000e+00 : f32
    %55 = vector.broadcast %cst_25 : f32 to vector<8x256xf32>
    %56 = arith.maximumf %54, %55 : vector<8x256xf32>
    %c0_26 = arith.constant 0 : index
    %c0_27 = arith.constant 0 : index
    %57 = vector.load %arg7[%c0_26, %c0_27] : memref<256x128xbf16, #tpu.memory_space<vmem>>, vector<256x128xbf16>
    %58 = arith.extf %57 : vector<256x128xbf16> to vector<256x128xf32>
    %cst_28 = arith.constant dense<0.000000e+00> : vector<8x128xf32>
    %59 = tpu.matmul %56, %58, %cst_28 {dimension_numbers = #tpu.dot_dimension_numbers<[1], [0], [0], [1], [0, 0, 1, 1], [], []>} : vector<8x256xf32>, vector<256x128xf32>, vector<8x128xf32> -> vector<8x128xf32>
    %c0_29 = arith.constant 0 : index
    %c0_30 = arith.constant 0 : index
    %60 = vector.load %arg8[%c0_29, %c0_30] : memref<1x128xf32, #tpu.memory_space<vmem>>, vector<1x128xf32>
    %61 = vector.broadcast %60 : vector<1x128xf32> to vector<8x128xf32>
    %62 = arith.addf %59, %61 : vector<8x128xf32>
    %cst_31 = arith.constant 0.000000e+00 : f32
    %63 = vector.broadcast %cst_31 : f32 to vector<8x128xf32>
    %64 = arith.subf %63, %62 : vector<8x128xf32>
    %65 = math.exp %64 : vector<8x128xf32>
    %cst_32 = arith.constant 1.000000e+00 : f32
    %66 = vector.broadcast %cst_32 : f32 to vector<8x128xf32>
    %67 = arith.addf %66, %65 : vector<8x128xf32>
    %cst_33 = arith.constant 1.000000e+00 : f32
    %68 = vector.broadcast %cst_33 : f32 to vector<8x128xf32>
    %69 = arith.divf %68, %67 : vector<8x128xf32>
    %c0_34 = arith.constant 0 : index
    %c0_35 = arith.constant 0 : index
    %70 = vector.load %arg9[%c0_34, %c0_35] : memref<8x128xf32, #tpu.memory_space<vmem>>, vector<8x128xf32>
    tpu.vector_store %arg9[%c0_34, %c0_35], %69 {strides = array<i32>} : memref<8x128xf32, #tpu.memory_space<vmem>>, vector<8x128xf32>,
    return
  }
}

</mosaic_0001>

<bundles_post_ra>
// kernel: tpu_custom_call.1
= control target key start
LH: loop header
LB: loop body
LE: loop exit
PB: predicated region body
PF: predicated region fallthrough
CT: control target
= control target key end

     0   :  { %14 = vsyncpa [#allocation3], 0  ;;  %s2510_s0 = inlined_call_operand.hbm [shape: f32[8,784], index: 0, kind: input, shape index: {}]   ;;  %s2511_s1 = inlined_call_operand.hbm [shape: bf16[784,512], index: 1, kind: input, shape index: {}]   ;;  %s2512_s2 = inlined_call_operand.hbm [shape: f32[1,512], index: 2, kind: input, shape index: {}]   ;;  %s2513_s3 = inlined_call_operand.vmem [shape: f32[1,512], index: 3, kind: input, shape index: {}]   ;;  %s2514_s4 = inlined_call_operand.hbm [shape: bf16[512,256], index: 4, kind: input, shape index: {}]   ;;  %s2515_s5 = inlined_call_operand.vmem [shape: f32[1,256], index: 5, kind: input, shape index: {}]   ;;  %s2516_s6 = inlined_call_operand.vmem [shape: f32[1,256], index: 6, kind: input, shape index: {}]   ;;  %s2517_s7 = inlined_call_operand.hbm [shape: bf16[256,128], index: 7, kind: input, shape index: {}]   ;;  %s2518_s8 = inlined_call_operand.vmem [shape: f32[1,128], index: 8, kind: input, shape index: {}]   ;;  %s2519_s9 = inlined_call_operand.hbm [shape: f32[8,128], index: 9, kind: output, shape index: {}]  }
   0x1   :  { %15 = vsyncpa [#allocation6], 0 }
   0x2   :  { %16 = vsyncpa [#allocation9], 0 }
   0x3   :  { %17 = vsyncpa [#allocation4], 0  ;;  %s2340_s30 = smov [#allocation5]  }
   0x4   :  { %s33_s10 = sshll.u32 %s2340_s30, 4  ;;  %s34_s10 = int_to_ptr.vmem [resolvable:$true] %s33_s10 }
   0x5   :  { %s2220_s11 = scalar_lea.vmem %s34_s10, 25088  ;;  %p2225_p1 = scmp.lt.s32.totalorder %s34_s10, %s34_s10 }
   0x6   :  { %p2221_p0 = scmp.ne.s32.totalorder %s34_s10, %s2220_s11  ;;  %p2226_p2 = scmp.lt.s32.totalorder %s2220_s11, %s2220_s11 }
   0x8   :  { %p2227_p3 = por %p2226_p2, %p2225_p1 }
   0xa   :  { %p2228_p4 = pnand %p2227_p3, %p2221_p0 }
   0xc   :  { %2231 = shalt.err (!%p2228_p4)
}
   0xd   :  { %s2341_s12 = smov 256   ;;  %s2342_s13 = smov 16  }
   0xe   :  { %39 = dma.hbm_to_vmem [thread:$0]  %s2511_s1, 25088, %s34_s10, [#allocation6], %s2341_s12, %s2341_s12, %s2342_s13  }
   0xf   :  { %s2343_s16 = smov [#allocation8]  }
  0x10   :  { %s57_s17 = sshll.u32 %s2343_s16, 4  ;;  %s58_s17 = int_to_ptr.vmem [resolvable:$true] %s57_s17 }
  0x11   :  { %s2240_s18 = scalar_lea.vmem %s58_s17, 8192  ;;  %p2245_p6 = scmp.lt.s32.totalorder %s58_s17, %s58_s17 }
  0x12   :  { %p2241_p5 = scmp.ne.s32.totalorder %s58_s17, %s2240_s18  ;;  %p2246_p7 = scmp.lt.s32.totalorder %s2240_s18, %s2240_s18 }
  0x14   :  { %p2247_p8 = por %p2246_p7, %p2245_p6 }
  0x16   :  { %p2248_p9 = pnand %p2247_p8, %p2241_p5 }
  0x18   :  { %2251 = shalt.err (!%p2248_p9)
}
  0x19   :  { %s2344_s19 = smov 128   ;;  %s2345_s20 = smov 8  }
  0x1a   :  { %63 = dma.hbm_to_vmem [thread:$0]  %s2514_s4, 8192, %s58_s17, [#allocation9], %s2344_s19, %s2344_s19, %s2345_s20  }
  0x1b   :  { %s2346_s23 = smov [#allocation2]   ;;  %s2347_s25 = smov [#allocation7]  }
  0x1c   :  { %s24_s24 = sshll.u32 %s2346_s23, 4  ;;  %s46_s1 = sshll.u32 %s2347_s25, 4  ;;  %s25_s24 = int_to_ptr.vmem [resolvable:$true] %s24_s24  ;;  %s47_s1 = int_to_ptr.vmem [resolvable:$true] %s46_s1 }
  0x1d   :  { %s2260_s26 = scalar_lea.vmem %s25_s24, 896  ;;  %p2265_p11 = scmp.lt.s32.totalorder %s25_s24, %s25_s24 }
  0x1e   :  { %p2261_p10 = scmp.ne.s32.totalorder %s25_s24, %s2260_s26  ;;  %p2266_p12 = scmp.lt.s32.totalorder %s2260_s26, %s2260_s26 }
  0x20   :  { %p2267_p13 = por %p2266_p12, %p2265_p11 }
  0x22   :  { %p2268_p0 = pnand %p2267_p13, %p2261_p10 }
  0x24   :  { %2271 = shalt.err (!%p2268_p0)
}
  0x25   :  { %27 = dma.hbm_to_vmem [thread:$0]  %s2510_s0, 896, %s25_s24, [#allocation3]  }
  0x26   :  { %s2280_s29 = scalar_lea.vmem %s47_s1, 64  ;;  %p2285_p2 = scmp.lt.s32.totalorder %s47_s1, %s47_s1 }
  0x27   :  { %p2281_p1 = scmp.ne.s32.totalorder %s47_s1, %s2280_s29  ;;  %p2286_p3 = scmp.lt.s32.totalorder %s2280_s29, %s2280_s29 }
  0x29   :  { %p2287_p4 = por %p2286_p3, %p2285_p2 }
  0x2b   :  { %p2288_p5 = pnand %p2287_p4, %p2281_p1 }
  0x2d   :  { %2291 = shalt.err (!%p2288_p5)
}
  0x2e   :  { %49 = dma.hbm_to_vmem [thread:$0]  %s2512_s2, 64, %s47_s1, [#allocation6]  }
  0x2f   :  { %s2348_s10 = smov [#allocation10]  }
  0x30   :  { %s73_s11 = sshll.u32 %s2348_s10, 4  ;;  %s74_s11 = int_to_ptr.vmem [resolvable:$true] %s73_s11 }
  0x31   :  { %s2300_s12 = scalar_lea.vmem %s74_s11, 2048  ;;  %p2305_p7 = scmp.lt.s32.totalorder %s74_s11, %s74_s11 }
  0x32   :  { %p2301_p6 = scmp.ne.s32.totalorder %s74_s11, %s2300_s12  ;;  %p2306_p8 = scmp.lt.s32.totalorder %s2300_s12, %s2300_s12 }
  0x34   :  { %p2307_p9 = por %p2306_p8, %p2305_p7 }
  0x36   :  { %p2308_p10 = pnand %p2307_p9, %p2301_p6 }
  0x38   :  { %2311 = shalt.err (!%p2308_p10)
}
  0x39   :  { %s2349_s0 = smov 64   ;;  %s2350_s13 = smov 4  }
  0x3a   :  { %79 = dma.hbm_to_vmem [thread:$0]  %s2517_s7, 2048, %s74_s11, [#allocation9], %s2349_s0, %s2349_s0, %s2350_s13  }
  0x3b   :  { %2332 = dma.done.wait [#allocation3], 896  }
  0x3c   :  { %2333 = vsyncadd [#allocation3], 4294966400 }
  0x3d   :  { %2334 = dma.done.wait [#allocation6], 25152  }
  0x3e   :  { %2335 = vsyncadd [#allocation6], 4294942144 }
  0x3f   :  { %2336 = dma.done.wait [#allocation9], 10240  }
  0x40   :  { %2337 = vsyncadd [#allocation9], 4294957056  ;;  %v134_v0 = vld [vmem:[#allocation5 + $0xf0] sm:$0xff]  ;;  %v132_v2 = vld [vmem:[#allocation5 + $0xe0] sm:$0xff]  ;;  %vm692_vm0 = vcmask 130048  }
  0x41   :  { %v198_v1 = vld [vmem:[#allocation5 + $0x2f0] sm:$0xff]  ;;  %v361_v3 = vunpack.c.h.bf16 %v134_v0  ;;  %v360_v5 = vunpack.c.l.bf16 %v134_v0  ;;  %v196_v7 = vld [vmem:[#allocation5 + $0x2e0] sm:$0xff]  ;;  %v357_v10 = vunpack.c.h.bf16 %v132_v2  ;;  %v356_v12 = vunpack.c.l.bf16 %v132_v2 }
  0x42   :  { %v489_v4 = vunpack.c.h.bf16 %v198_v1  ;;  %v488_v6 = vunpack.c.l.bf16 %v198_v1  ;;  %v130_v8 = vld [vmem:[#allocation5 + $0xd0] sm:$0xff]  ;;  %v485_v11 = vunpack.c.h.bf16 %v196_v7  ;;  %v484_v13 = vunpack.c.l.bf16 %v196_v7  ;;  %v128_v14 = vld [vmem:[#allocation5 + $0xc0] sm:$0xff] }
  0x43   :  { %v194_v9 = vld [vmem:[#allocation5 + $0x2d0] sm:$0xff]  ;;  %v192_v15 = vld [vmem:[#allocation5 + $0x2c0] sm:$0xff]  ;;  %696 = vmatprep.subr.mxu0 %v361_v3  ;;  %v353_v16 = vunpack.c.h.bf16 %v130_v8  ;;  %v352_v18 = vunpack.c.l.bf16 %v130_v8  ;;  %v349_v22 = vunpack.c.h.bf16 %v128_v14  ;;  %v348_v24 = vunpack.c.l.bf16 %v128_v14 }
  0x44   :  { %767 = vmatprep.subr.mxu1 %v489_v4  ;;  %v481_v17 = vunpack.c.h.bf16 %v194_v9  ;;  %697 = vmatpush1.msra.mxu0 %v360_v5  ;;  %v480_v19 = vunpack.c.l.bf16 %v194_v9  ;;  %v126_v20 = vld [vmem:[#allocation5 + $0xb0] sm:$0xff]  ;;  %v477_v23 = vunpack.c.h.bf16 %v192_v15  ;;  %v476_v25 = vunpack.c.l.bf16 %v192_v15  ;;  %v124_v26 = vld [vmem:[#allocation5 + $0xa0] sm:$0xff] }
  0x45   :  { %768 = vmatpush1.msra.mxu1 %v488_v6  ;;  %v190_v21 = vld [vmem:[#allocation5 + $0x2b0] sm:$0xff]  ;;  %698 = vmatprep.subr.mxu0 %v357_v10  ;;  %v188_v27 = vld [vmem:[#allocation5 + $0x2a0] sm:$0xff]  ;;  %v345_v28 = vunpack.c.h.bf16 %v126_v20  ;;  %v344_v30 = vunpack.c.l.bf16 %v126_v20  ;;  %v341_v34 = vunpack.c.h.bf16 %v124_v26  ;;  %v340_v36 = vunpack.c.l.bf16 %v124_v26 }
  0x46   :  { %769 = vmatprep.subr.mxu1 %v485_v11  ;;  %699 = vmatpush1.msra.mxu0 %v356_v12  ;;  %v473_v29 = vunpack.c.h.bf16 %v190_v21  ;;  %v472_v31 = vunpack.c.l.bf16 %v190_v21  ;;  %v122_v32 = vld [vmem:[#allocation5 + $0x90] sm:$0xff]  ;;  %v469_v35 = vunpack.c.h.bf16 %v188_v27  ;;  %v468_v37 = vunpack.c.l.bf16 %v188_v27  ;;  %v120_v38 = vld [vmem:[#allocation5 + $0x80] sm:$0xff] }
  0x47   :  { %770 = vmatpush1.msra.mxu1 %v484_v13  ;;  %700 = vmatprep.subr.mxu0 %v353_v16  ;;  %v186_v33 = vld [vmem:[#allocation5 + $0x290] sm:$0xff]  ;;  %v184_v39 = vld [vmem:[#allocation5 + $0x280] sm:$0xff]  ;;  %v337_v40 = vunpack.c.h.bf16 %v122_v32  ;;  %v336_v42 = vunpack.c.l.bf16 %v122_v32  ;;  %v333_v46 = vunpack.c.h.bf16 %v120_v38  ;;  %v332_v48 = vunpack.c.l.bf16 %v120_v38 }
  0x48   :  { %771 = vmatprep.subr.mxu1 %v481_v17  ;;  %701 = vmatpush1.msra.mxu0 %v352_v18  ;;  %v465_v41 = vunpack.c.h.bf16 %v186_v33  ;;  %v464_v43 = vunpack.c.l.bf16 %v186_v33  ;;  %v118_v44 = vld [vmem:[#allocation5 + $0x70] sm:$0xff]  ;;  %v461_v47 = vunpack.c.h.bf16 %v184_v39  ;;  %v460_v49 = vunpack.c.l.bf16 %v184_v39  ;;  %v116_v50 = vld [vmem:[#allocation5 + $0x60] sm:$0xff] }
  0x49   :  { %772 = vmatpush1.msra.mxu1 %v480_v19  ;;  %702 = vmatprep.subr.mxu0 %v349_v22  ;;  %v182_v45 = vld [vmem:[#allocation5 + $0x270] sm:$0xff]  ;;  %v180_v51 = vld [vmem:[#allocation5 + $0x260] sm:$0xff]  ;;  %v329_v52 = vunpack.c.h.bf16 %v118_v44  ;;  %v328_v54 = vunpack.c.l.bf16 %v118_v44  ;;  %v325_v58 = vunpack.c.h.bf16 %v116_v50  ;;  %v324_v60 = vunpack.c.l.bf16 %v116_v50 }
  0x4a   :  { %773 = vmatprep.subr.mxu1 %v477_v23  ;;  %703 = vmatpush1.msra.mxu0 %v348_v24  ;;  %v457_v53 = vunpack.c.h.bf16 %v182_v45  ;;  %v456_v55 = vunpack.c.l.bf16 %v182_v45  ;;  %v114_v56 = vld [vmem:[#allocation5 + $0x50] sm:$0xff]  ;;  %v453_v59 = vunpack.c.h.bf16 %v180_v51  ;;  %v452_v61 = vunpack.c.l.bf16 %v180_v51  ;;  %v112_v62 = vld [vmem:[#allocation5 + $0x40] sm:$0xff] }
  0x4b   :  { %774 = vmatpush1.msra.mxu1 %v476_v25  ;;  %704 = vmatprep.subr.mxu0 %v345_v28  ;;  %v178_v57 = vld [vmem:[#allocation5 + $0x250] sm:$0xff]  ;;  %v176_v63 = vld [vmem:[#allocation5 + $0x240] sm:$0xff]  ;;  %v321_v0 = vunpack.c.h.bf16 %v114_v56  ;;  %v320_v2 = vunpack.c.l.bf16 %v114_v56  ;;  %v317_v6 = vunpack.c.h.bf16 %v112_v62  ;;  %v316_v8 = vunpack.c.l.bf16 %v112_v62 }
  0x4c   :  { %775 = vmatprep.subr.mxu1 %v473_v29  ;;  %705 = vmatpush1.msra.mxu0 %v344_v30  ;;  %v449_v1 = vunpack.c.h.bf16 %v178_v57  ;;  %v448_v3 = vunpack.c.l.bf16 %v178_v57  ;;  %v110_v4 = vld [vmem:[#allocation5 + $0x30] sm:$0xff]  ;;  %v445_v7 = vunpack.c.h.bf16 %v176_v63  ;;  %v444_v9 = vunpack.c.l.bf16 %v176_v63  ;;  %v108_v10 = vld [vmem:[#allocation5 + $0x20] sm:$0xff] }
  0x4d   :  { %776 = vmatpush1.msra.mxu1 %v472_v31  ;;  %706 = vmatprep.subr.mxu0 %v341_v34  ;;  %v174_v5 = vld [vmem:[#allocation5 + $0x230] sm:$0xff]  ;;  %v172_v11 = vld [vmem:[#allocation5 + $0x220] sm:$0xff]  ;;  %v313_v12 = vunpack.c.h.bf16 %v110_v4  ;;  %v312_v14 = vunpack.c.l.bf16 %v110_v4  ;;  %v309_v18 = vunpack.c.h.bf16 %v108_v10  ;;  %v308_v20 = vunpack.c.l.bf16 %v108_v10 }
  0x4e   :  { %777 = vmatprep.subr.mxu1 %v469_v35  ;;  %707 = vmatpush1.msra.mxu0 %v340_v36  ;;  %v441_v13 = vunpack.c.h.bf16 %v174_v5  ;;  %v440_v15 = vunpack.c.l.bf16 %v174_v5  ;;  %v106_v16 = vld [vmem:[#allocation5 + $0x10] sm:$0xff]  ;;  %v437_v19 = vunpack.c.h.bf16 %v172_v11  ;;  %v436_v21 = vunpack.c.l.bf16 %v172_v11  ;;  %v104_v22 = vld [vmem:[#allocation5] sm:$0xff] }
  0x4f   :  { %778 = vmatpush1.msra.mxu1 %v468_v37  ;;  %708 = vmatprep.subr.mxu0 %v337_v40  ;;  %v170_v17 = vld [vmem:[#allocation5 + $0x210] sm:$0xff]  ;;  %v168_v23 = vld [vmem:[#allocation5 + $0x200] sm:$0xff]  ;;  %v305_v24 = vunpack.c.h.bf16 %v106_v16  ;;  %v304_v26 = vunpack.c.l.bf16 %v106_v16  ;;  %v301_v30 = vunpack.c.h.bf16 %v104_v22  ;;  %v300_v32 = vunpack.c.l.bf16 %v104_v22 }
  0x50   :  { %779 = vmatprep.subr.mxu1 %v465_v41  ;;  %709 = vmatpush1.msra.mxu0 %v336_v42  ;;  %v433_v25 = vunpack.c.h.bf16 %v170_v17  ;;  %v432_v27 = vunpack.c.l.bf16 %v170_v17  ;;  %v166_v28 = vld [vmem:[#allocation5 + $0x1f0] sm:$0xff]  ;;  %v429_v31 = vunpack.c.h.bf16 %v168_v23  ;;  %v428_v33 = vunpack.c.l.bf16 %v168_v23  ;;  %v164_v34 = vld [vmem:[#allocation5 + $0x1e0] sm:$0xff] }
  0x51   :  { %780 = vmatpush1.msra.mxu1 %v464_v43  ;;  %710 = vmatprep.subr.mxu0 %v333_v46  ;;  %v230_v29 = vld [vmem:[#allocation5 + $0x3f0] sm:$0xff]  ;;  %v228_v35 = vld [vmem:[#allocation5 + $0x3e0] sm:$0xff]  ;;  %v425_v36 = vunpack.c.h.bf16 %v166_v28  ;;  %v424_v38 = vunpack.c.l.bf16 %v166_v28  ;;  %v421_v42 = vunpack.c.h.bf16 %v164_v34  ;;  %v420_v44 = vunpack.c.l.bf16 %v164_v34 }
  0x52   :  { %781 = vmatprep.subr.mxu1 %v461_v47  ;;  %711 = vmatpush1.msra.mxu0 %v332_v48  ;;  %v553_v37 = vunpack.c.h.bf16 %v230_v29  ;;  %v552_v39 = vunpack.c.l.bf16 %v230_v29  ;;  %v162_v40 = vld [vmem:[#allocation5 + $0x1d0] sm:$0xff]  ;;  %v549_v43 = vunpack.c.h.bf16 %v228_v35  ;;  %v548_v45 = vunpack.c.l.bf16 %v228_v35  ;;  %v160_v46 = vld [vmem:[#allocation5 + $0x1c0] sm:$0xff] }
  0x53   :  { %782 = vmatpush1.msra.mxu1 %v460_v49  ;;  %712 = vmatprep.subr.mxu0 %v329_v52  ;;  %v226_v41 = vld [vmem:[#allocation5 + $0x3d0] sm:$0xff]  ;;  %v224_v47 = vld [vmem:[#allocation5 + $0x3c0] sm:$0xff]  ;;  %v417_v48 = vunpack.c.h.bf16 %v162_v40  ;;  %v416_v50 = vunpack.c.l.bf16 %v162_v40  ;;  %v412_v56 = vunpack.c.l.bf16 %v160_v46 }
  0x54   :  { %783 = vmatprep.subr.mxu1 %v457_v53  ;;  %713 = vmatpush1.msra.mxu0 %v328_v54  ;;  %v545_v49 = vunpack.c.h.bf16 %v226_v41  ;;  %v544_v51 = vunpack.c.l.bf16 %v226_v41  ;;  %v158_v52 = vld [vmem:[#allocation5 + $0x1b0] sm:$0xff]  ;;  %v413_v54 = vunpack.c.h.bf16 %v160_v46  ;;  %v540_v57 = vunpack.c.l.bf16 %v224_v47 }
  0x55   :  { %784 = vmatpush1.msra.mxu1 %v456_v55  ;;  %714 = vmatprep.subr.mxu0 %v325_v58  ;;  %v222_v53 = vld [vmem:[#allocation5 + $0x3b0] sm:$0xff]  ;;  %v541_v55 = vunpack.c.h.bf16 %v224_v47  ;;  %v156_v58 = vld [vmem:[#allocation5 + $0x1a0] sm:$0xff]  ;;  %v408_v62 = vunpack.c.l.bf16 %v158_v52 }
  0x56   :  { %785 = vmatprep.subr.mxu1 %v453_v59  ;;  %715 = vmatpush1.msra.mxu0 %v324_v60  ;;  %v220_v59 = vld [vmem:[#allocation5 + $0x3a0] sm:$0xff]  ;;  %v409_v60 = vunpack.c.h.bf16 %v158_v52  ;;  %v536_v63 = vunpack.c.l.bf16 %v222_v53  ;;  %v404_v4 = vunpack.c.l.bf16 %v156_v58 }
  0x57   :  { %786 = vmatpush1.msra.mxu1 %v452_v61  ;;  %716 = vmatprep.subr.mxu0 %v321_v0  ;;  %v537_v61 = vunpack.c.h.bf16 %v222_v53  ;;  %v154_v0 = vld [vmem:[#allocation5 + $0x190] sm:$0xff]  ;;  %v532_v5 = vunpack.c.l.bf16 %v220_v59 }
  0x58   :  { %787 = vmatprep.subr.mxu1 %v449_v1  ;;  %717 = vmatpush1.msra.mxu0 %v320_v2  ;;  %v218_v1 = vld [vmem:[#allocation5 + $0x390] sm:$0xff]  ;;  %v405_v2 = vunpack.c.h.bf16 %v156_v58  ;;  %v400_v10 = vunpack.c.l.bf16 %v154_v0 }
  0x59   :  { %788 = vmatpush1.msra.mxu1 %v448_v3  ;;  %718 = vmatprep.subr.mxu0 %v317_v6  ;;  %v533_v3 = vunpack.c.h.bf16 %v220_v59  ;;  %v152_v6 = vld [vmem:[#allocation5 + $0x180] sm:$0xff]  ;;  %v528_v11 = vunpack.c.l.bf16 %v218_v1 }
  0x5a   :  { %789 = vmatprep.subr.mxu1 %v445_v7  ;;  %719 = vmatpush1.msra.mxu0 %v316_v8  ;;  %v216_v7 = vld [vmem:[#allocation5 + $0x380] sm:$0xff]  ;;  %v401_v8 = vunpack.c.h.bf16 %v154_v0  ;;  %v396_v16 = vunpack.c.l.bf16 %v152_v6  ;;  %v298_v0 = vld [vmem:[#allocation5 + $0x610] sm:$0xff] }
  0x5b   :  { %790 = vmatpush1.msra.mxu1 %v444_v9  ;;  %720 = vmatprep.subr.mxu0 %v313_v12  ;;  %v529_v9 = vunpack.c.h.bf16 %v218_v1  ;;  %v150_v12 = vld [vmem:[#allocation5 + $0x170] sm:$0xff]  ;;  %v524_v17 = vunpack.c.l.bf16 %v216_v7 }
  0x5c   :  { %791 = vmatprep.subr.mxu1 %v441_v13  ;;  %721 = vmatpush1.msra.mxu0 %v312_v14  ;;  %v214_v13 = vld [vmem:[#allocation5 + $0x370] sm:$0xff]  ;;  %v397_v14 = vunpack.c.h.bf16 %v152_v6  ;;  %v392_v22 = vunpack.c.l.bf16 %v150_v12  ;;  %v2421_v6 = vld [vmem:[#allocation2] sm:$0xff] }
  0x5d   :  { %792 = vmatpush1.msra.mxu1 %v440_v15  ;;  %722 = vmatprep.subr.mxu0 %v309_v18  ;;  %v525_v15 = vunpack.c.h.bf16 %v216_v7  ;;  %v148_v18 = vld [vmem:[#allocation5 + $0x160] sm:$0xff]  ;;  %v520_v23 = vunpack.c.l.bf16 %v214_v13  ;;  %v2419_v1 = vld [vmem:[#allocation2 + $0x8] sm:$0xff]  ;;  %v99_v7 = vld [vmem:[#allocation2 + $0x10] sm:$0xff] }
  0x5e   :  { %793 = vmatprep.subr.mxu1 %v437_v19  ;;  %723 = vmatpush1.msra.mxu0 %v308_v20  ;;  %v212_v19 = vld [vmem:[#allocation5 + $0x360] sm:$0xff]  ;;  %v393_v20 = vunpack.c.h.bf16 %v150_v12  ;;  %v388_v28 = vunpack.c.l.bf16 %v148_v18  ;;  %v258_v12 = vld [vmem:[#allocation5 + $0x4d0] sm:$0xff] }
  0x5f   :  { %794 = vmatpush1.msra.mxu1 %v436_v21  ;;  %724 = vmatprep.subr.mxu0 %v305_v24  ;;  %v521_v21 = vunpack.c.h.bf16 %v214_v13  ;;  %v146_v24 = vld [vmem:[#allocation5 + $0x150] sm:$0xff]  ;;  %v516_v29 = vunpack.c.l.bf16 %v212_v19 }
  0x60   :  { %795 = vmatprep.subr.mxu1 %v433_v25  ;;  %725 = vmatpush1.msra.mxu0 %v304_v26  ;;  %v210_v25 = vld [vmem:[#allocation5 + $0x350] sm:$0xff]  ;;  %v389_v26 = vunpack.c.h.bf16 %v148_v18  ;;  %v384_v34 = vunpack.c.l.bf16 %v146_v24  ;;  %v609_v18 = vunpack.c.h.bf16 %v258_v12 }
  0x61   :  { %796 = vmatpush1.msra.mxu1 %v432_v27  ;;  %726 = vmatprep.subr.mxu0 %v301_v30  ;;  %v517_v27 = vunpack.c.h.bf16 %v212_v19  ;;  %v144_v30 = vld [vmem:[#allocation5 + $0x140] sm:$0xff]  ;;  %v512_v35 = vunpack.c.l.bf16 %v210_v25 }
  0x62   :  { %797 = vmatprep.subr.mxu1 %v429_v31  ;;  %727 = vmatpush1.msra.mxu0 %v300_v32  ;;  %v208_v31 = vld [vmem:[#allocation5 + $0x340] sm:$0xff]  ;;  %v385_v32 = vunpack.c.h.bf16 %v146_v24  ;;  %v380_v40 = vunpack.c.l.bf16 %v144_v30 }
  0x63   :  { %798 = vmatpush1.msra.mxu1 %v428_v33  ;;  %728 = vmatprep.subr.mxu0 %v425_v36  ;;  %v513_v33 = vunpack.c.h.bf16 %v210_v25  ;;  %v142_v36 = vld [vmem:[#allocation5 + $0x130] sm:$0xff]  ;;  %v508_v41 = vunpack.c.l.bf16 %v208_v31  ;;  %v256_v19 = vld [vmem:[#allocation5 + $0x4c0] sm:$0xff] }
  0x64   :  { %799 = vmatprep.subr.mxu1 %v553_v37  ;;  %729 = vmatpush2.msra.mxu0 %v424_v38  ;;  %v206_v37 = vld [vmem:[#allocation5 + $0x330] sm:$0xff]  ;;  %v381_v38 = vunpack.c.h.bf16 %v144_v30  ;;  %v376_v46 = vunpack.c.l.bf16 %v142_v36  ;;  %v604_v30 = vunpack.c.l.bf16 %v256_v19 }
  0x65   :  { %800 = vmatpush2.msra.mxu1 %v552_v39  ;;  %730 = vmatprep.subr.mxu0 %v421_v42  ;;  %v509_v39 = vunpack.c.h.bf16 %v208_v31  ;;  %v140_v42 = vld [vmem:[#allocation5 + $0x120] sm:$0xff]  ;;  %v504_v47 = vunpack.c.l.bf16 %v206_v37  ;;  %v254_v25 = vld [vmem:[#allocation5 + $0x4b0] sm:$0xff] }
  0x66   :  { %801 = vmatprep.subr.mxu1 %v549_v43  ;;  %731 = vmatpush2.msra.mxu0 %v420_v44  ;;  %v204_v43 = vld [vmem:[#allocation5 + $0x320] sm:$0xff]  ;;  %v377_v44 = vunpack.c.h.bf16 %v142_v36  ;;  %v372_v52 = vunpack.c.l.bf16 %v140_v42  ;;  %v600_v36 = vunpack.c.l.bf16 %v254_v25 }
  0x67   :  { %802 = vmatpush2.msra.mxu1 %v548_v45  ;;  %732 = vmatprep.subr.mxu0 %v417_v48  ;;  %v505_v45 = vunpack.c.h.bf16 %v206_v37  ;;  %v138_v48 = vld [vmem:[#allocation5 + $0x110] sm:$0xff]  ;;  %v500_v53 = vunpack.c.l.bf16 %v204_v43 }
  0x68   :  { %803 = vmatprep.subr.mxu1 %v545_v49  ;;  %733 = vmatpush2.msra.mxu0 %v416_v50  ;;  %v202_v49 = vld [vmem:[#allocation5 + $0x310] sm:$0xff]  ;;  %v373_v50 = vunpack.c.h.bf16 %v140_v42  ;;  %v368_v58 = vunpack.c.l.bf16 %v138_v48 }
  0x69   :  { %804 = vmatpush2.msra.mxu1 %v544_v51  ;;  %734 = vmatprep.subr.mxu0 %v413_v54  ;;  %v501_v51 = vunpack.c.h.bf16 %v204_v43  ;;  %v136_v54 = vld [vmem:[#allocation5 + $0x100] sm:$0xff]  ;;  %v496_v59 = vunpack.c.l.bf16 %v202_v49 }
  0x6a   :  { %805 = vmatprep.subr.mxu1 %v541_v55  ;;  %735 = vmatpush2.msra.mxu0 %v412_v56  ;;  %v200_v55 = vld [vmem:[#allocation5 + $0x300] sm:$0xff]  ;;  %v369_v56 = vunpack.c.h.bf16 %v138_v48 }
  0x6b   :  { %806 = vmatpush2.msra.mxu1 %v540_v57  ;;  %736 = vmatprep.subr.mxu0 %v409_v60  ;;  %v497_v57 = vunpack.c.h.bf16 %v202_v49  ;;  %v365_v60 = vunpack.c.h.bf16 %v136_v54 }
  0x6c   :  { %807 = vmatprep.subr.mxu1 %v537_v61  ;;  %737 = vmatpush2.msra.mxu0 %v408_v62  ;;  %v493_v61 = vunpack.c.h.bf16 %v200_v55  ;;  %v364_v62 = vunpack.c.l.bf16 %v136_v54 }
  0x6d   :  { %808 = vmatpush2.msra.mxu1 %v536_v63  ;;  %738 = vmatprep.subr.mxu0 %v405_v2  ;;  %v262_v63 = vld [vmem:[#allocation5 + $0x4f0] sm:$0xff]  ;;  %v492_v2 = vunpack.c.l.bf16 %v200_v55 }
  0x6e   :  { %809 = vmatprep.subr.mxu1 %v533_v3  ;;  %739 = vmatpush2.msra.mxu0 %v404_v4  ;;  %v100_v3 = vld [vmem:[#allocation2 + $0x18] sm:$0xff] }
  0x6f   :  { %810 = vmatpush2.msra.mxu1 %v532_v5  ;;  %740 = vmatprep.subr.mxu0 %v401_v8  ;;  %v260_v4 = vld [vmem:[#allocation5 + $0x4e0] sm:$0xff]  ;;  %v617_v8 = vunpack.c.h.bf16 %v262_v63 }
  0x70   :  { %811 = vmatprep.subr.mxu1 %v529_v9  ;;  %741 = vmatpush2.msra.mxu0 %v400_v10  ;;  %v296_v5 = vld [vmem:[#allocation5 + $0x600] sm:$0xff]  ;;  %v689_v9 = vunpack.c.h.bf16 %v298_v0  ;;  %v616_v10 = vunpack.c.l.bf16 %v262_v63  ;;  %v613_v13 = vunpack.c.h.bf16 %v260_v4  ;;  %v119_v63 = vld [vmem:[#allocation5 + $0x78] sm:$0xff] }
  0x71   :  { %812 = vmatpush2.msra.mxu1 %v528_v11  ;;  %742 = vmatprep.subr.mxu0 %v397_v14  ;;  %v688_v11 = vunpack.c.l.bf16 %v298_v0  ;;  %v685_v14 = vunpack.c.h.bf16 %v296_v5 }
  0x72   :  { %813 = vmatprep.subr.mxu1 %v525_v15  ;;  %743 = vmatpush2.msra.mxu0 %v396_v16  ;;  %v135_v15 = vld [vmem:[#allocation5 + $0xf8] sm:$0xff]  ;;  %v612_v16 = vunpack.c.l.bf16 %v260_v4 }
  0x73   :  { %814 = vmatpush2.msra.mxu1 %v524_v17  ;;  %744 = vmatprep.subr.mxu0 %v393_v20  ;;  %v684_v17 = vunpack.c.l.bf16 %v296_v5  ;;  %v133_v20 = vld [vmem:[#allocation5 + $0xe8] sm:$0xff]  ;;  %v362_v24 = vunpack.c.l.bf16 %v135_v15  ;;  %v240_v5 = vld [vmem:[#allocation5 + $0x440] sm:$0xff] }
  0x74   :  { %815 = vmatprep.subr.mxu1 %v521_v21  ;;  %745 = vmatpush2.msra.mxu0 %v392_v22  ;;  %v363_v21 = vunpack.c.h.bf16 %v135_v15  ;;  %v608_v22 = vunpack.c.l.bf16 %v258_v12  ;;  %v358_v31 = vunpack.c.l.bf16 %v133_v20  ;;  %v238_v12 = vld [vmem:[#allocation5 + $0x430] sm:$0xff] }
  0x75   :  { %816 = vmatpush2.msra.mxu1 %v520_v23  ;;  %746 = vmatprep.subr.mxu0 %v389_v26  ;;  %v103_v23 = vld [vmem:[#allocation2 + $0x30] sm:$0xff] }
  0x76   :  { %817 = vmatprep.subr.mxu1 %v517_v27  ;;  %747 = vmatpush2.msra.mxu0 %v388_v28  ;;  %v131_v26 = vld [vmem:[#allocation5 + $0xd8] sm:$0xff]  ;;  %v605_v27 = vunpack.c.h.bf16 %v256_v19  ;;  %v359_v28 = vunpack.c.h.bf16 %v133_v20  ;;  %v113_v19 = vld [vmem:[#allocation5 + $0x48] sm:$0xff]  ;;  %v569_v20 = vunpack.c.h.bf16 %v238_v12 }
  0x77   :  { %818 = vmatpush2.msra.mxu1 %v516_v29  ;;  %748 = vmatprep.subr.mxu0 %v385_v32  ;;  %v2351_v29 = vmov 0.0   ;;  %v252_v32 = vld [vmem:[#allocation5 + $0x4a0] sm:$0xff]  ;;  %v354_v37 = vunpack.c.l.bf16 %v131_v26 }
  0x78   :  { %819 = vmatprep.subr.mxu1 %v513_v33  ;;  %749 = vmatpush2.msra.mxu0 %v384_v34  ;;  %v129_v33 = vld [vmem:[#allocation5 + $0xc8] sm:$0xff]  ;;  %v601_v34 = vunpack.c.h.bf16 %v254_v25  ;;  %v596_v42 = vunpack.c.l.bf16 %v252_v32  ;;  %v111_v25 = vld [vmem:[#allocation5 + $0x38] sm:$0xff] }
  0x79   :  { %820 = vmatpush2.msra.mxu1 %v512_v35  ;;  %750 = vmatprep.subr.mxu0 %v381_v38  ;;  %v355_v35 = vunpack.c.h.bf16 %v131_v26  ;;  %v250_v38 = vld [vmem:[#allocation5 + $0x490] sm:$0xff]  ;;  %v350_v43 = vunpack.c.l.bf16 %v129_v33 }
  0x7a   :  { %821 = vmatprep.subr.mxu1 %v509_v39  ;;  %751 = vmatpush2.msra.mxu0 %v380_v40  ;;  %v127_v39 = vld [vmem:[#allocation5 + $0xb8] sm:$0xff]  ;;  %v597_v40 = vunpack.c.h.bf16 %v252_v32  ;;  %v592_v48 = vunpack.c.l.bf16 %v250_v38  ;;  %v109_v32 = vld [vmem:[#allocation5 + $0x28] sm:$0xff] }
  0x7b   :  { %822 = vmatpush2.msra.mxu1 %v508_v41  ;;  %752 = vmatprep.subr.mxu0 %v377_v44  ;;  %v351_v41 = vunpack.c.h.bf16 %v129_v33  ;;  %v248_v44 = vld [vmem:[#allocation5 + $0x480] sm:$0xff]  ;;  %v346_v49 = vunpack.c.l.bf16 %v127_v39 }
  0x7c   :  { %823 = vmatprep.subr.mxu1 %v505_v45  ;;  %753 = vmatpush2.msra.mxu0 %v376_v46  ;;  %v125_v45 = vld [vmem:[#allocation5 + $0xa8] sm:$0xff]  ;;  %v593_v46 = vunpack.c.h.bf16 %v250_v38  ;;  %v588_v54 = vunpack.c.l.bf16 %v248_v44  ;;  %v107_v38 = vld [vmem:[#allocation5 + $0x18] sm:$0xff] }
  0x7d   :  { %824 = vmatpush2.msra.mxu1 %v504_v47  ;;  %754 = vmatprep.subr.mxu0 %v373_v50  ;;  %v347_v47 = vunpack.c.h.bf16 %v127_v39  ;;  %v246_v50 = vld [vmem:[#allocation5 + $0x470] sm:$0xff]  ;;  %v342_v55 = vunpack.c.l.bf16 %v125_v45 }
  0x7e   :  { %825 = vmatprep.subr.mxu1 %v501_v51  ;;  %755 = vmatpush2.msra.mxu0 %v372_v52  ;;  %v123_v51 = vld [vmem:[#allocation5 + $0x98] sm:$0xff]  ;;  %v589_v52 = vunpack.c.h.bf16 %v248_v44  ;;  %v105_v44 = vld [vmem:[#allocation5 + $0x8] sm:$0xff] }
  0x7f   :  { %826 = vmatpush2.msra.mxu1 %v500_v53  ;;  %756 = vmatprep.subr.mxu0 %v369_v56  ;;  %v343_v53 = vunpack.c.h.bf16 %v125_v45  ;;  %v244_v56 = vld [vmem:[#allocation5 + $0x460] sm:$0xff] }
  0x80   :  { %827 = vmatprep.subr.mxu1 %v497_v57  ;;  %757 = vmatpush2.msra.mxu0 %v368_v58  ;;  %v121_v57 = vld [vmem:[#allocation5 + $0x88] sm:$0xff]  ;;  %v585_v58 = vunpack.c.h.bf16 %v246_v50  ;;  %v581_v0 = vunpack.c.h.bf16 %v244_v56 }
  0x81   :  { %828 = vmatpush2.msra.mxu1 %v496_v59  ;;  %758 = vmatprep.subr.mxu0 %v365_v60  ;;  %v339_v59 = vunpack.c.h.bf16 %v123_v51  ;;  %v584_v60 = vunpack.c.l.bf16 %v246_v50  ;;  %v334_v4 = vunpack.c.l.bf16 %v121_v57  ;;  %v167_v50 = vld [vmem:[#allocation5 + $0x1f8] sm:$0xff] }
  0x82   :  { %829 = vmatprep.subr.mxu1 %v493_v61  ;;  %759 = vmatpush2.msra.mxu0 %v364_v62  ;;  %v338_v61 = vunpack.c.l.bf16 %v123_v51  ;;  %v242_v62 = vld [vmem:[#allocation5 + $0x450] sm:$0xff] }
  0x83   :  { %760 = vmatprep.mubr.f32.mxu0 %v2419_v1  ;;  %830 = vmatpush2.msra.mxu1 %v492_v2  ;;  %v335_v2 = vunpack.c.h.bf16 %v121_v57 }
  0x84   :  { %831 = vmatprep.mubr.f32.mxu1 %v100_v3  ;;  %761 = vmatmul.mubr.f32.vlgmr.msra.gmra.mxu0 %v2421_v6  ;;  %v580_v3 = vunpack.c.l.bf16 %v244_v56  ;;  %v165_v56 = vld [vmem:[#allocation5 + $0x1e8] sm:$0xff] }
  0x85   :  { %832 = vmatmul.mubr.f32.vlgmr.msra.gmra.mxu1 %v99_v7  ;;  %838 = vmatprep.subr.mxu0 %v617_v8  ;;  %v117_v7 = vld [vmem:[#allocation5 + $0x68] sm:$0xff]  ;;  %v577_v8 = vunpack.c.h.bf16 %v242_v62 }
  0x86   :  { %937 = vmatprep.subr.mxu1 %v689_v9  ;;  %839 = vmatpush1.msra.mxu0 %v616_v10  ;;  %v331_v9 = vunpack.c.h.bf16 %v119_v63  ;;  %v576_v10 = vunpack.c.l.bf16 %v242_v62  ;;  %v327_v15 = vunpack.c.h.bf16 %v117_v7  ;;  %v163_v62 = vld [vmem:[#allocation5 + $0x1d8] sm:$0xff] }
  0x87   :  { %938 = vmatpush1.msra.mxu1 %v688_v11  ;;  %840 = vmatprep.subr.mxu0 %v613_v13  ;;  %v330_v11 = vunpack.c.l.bf16 %v119_v63  ;;  %v115_v13 = vld [vmem:[#allocation5 + $0x58] sm:$0xff] }
  0x88   :  { %939 = vmatprep.subr.mxu1 %v685_v14  ;;  %841 = vmatpush1.msra.mxu0 %v612_v16  ;;  %v573_v14 = vunpack.c.h.bf16 %v240_v5  ;;  %v572_v16 = vunpack.c.l.bf16 %v240_v5  ;;  %v161_v5 = vld [vmem:[#allocation5 + $0x1c8] sm:$0xff] }
  0x89   :  { %940 = vmatpush1.msra.mxu1 %v684_v17  ;;  %973 = vmatprep.mubr.f32.mxu1 %v2351_v29  ;;  %v326_v17 = vunpack.c.l.bf16 %v117_v7 }
  0x8a   :  { %842 = vmatprep.subr.mxu0 %v609_v18  ;;  %2062 = vmatmul.mubr.msk.f32.vlgmr.msra.gmra.mxu1 %vm692_vm0, %v103_v23  ;;  %v236_v18 = vld [vmem:[#allocation5 + $0x420] sm:$0xff]  ;;  %v322_v23 = vunpack.c.l.bf16 %v115_v13 }
  0x8b   :  { %980 = vmatprep.subr.mxu1 %v363_v21  ;;  %843 = vmatpush1.msra.mxu0 %v608_v22  ;;  %v323_v21 = vunpack.c.h.bf16 %v115_v13  ;;  %v568_v22 = vunpack.c.l.bf16 %v238_v12  ;;  %v565_v26 = vunpack.c.h.bf16 %v236_v18  ;;  %v159_v12 = vld [vmem:[#allocation5 + $0x1b8] sm:$0xff] }
  0x8c   :  { %981 = vmatpush1.msra.mxu1 %v362_v24  ;;  %844 = vmatprep.subr.mxu0 %v605_v27  ;;  %v234_v24 = vld [vmem:[#allocation5 + $0x410] sm:$0xff]  ;;  %v319_v27 = vunpack.c.h.bf16 %v113_v19 }
  0x8d   :  { %982 = vmatprep.subr.mxu1 %v359_v28  ;;  %845 = vmatpush1.msra.mxu0 %v604_v30  ;;  %v564_v28 = vunpack.c.l.bf16 %v236_v18  ;;  %v318_v30 = vunpack.c.l.bf16 %v113_v19  ;;  %v561_v33 = vunpack.c.h.bf16 %v234_v24  ;;  %v157_v18 = vld [vmem:[#allocation5 + $0x1a8] sm:$0xff] }
  0x8e   :  { %983 = vmatpush1.msra.mxu1 %v358_v31  ;;  %846 = vmatprep.subr.mxu0 %v601_v34  ;;  %v232_v31 = vld [vmem:[#allocation5 + $0x400] sm:$0xff]  ;;  %v315_v34 = vunpack.c.h.bf16 %v111_v25 }
  0x8f   :  { %984 = vmatprep.subr.mxu1 %v355_v35  ;;  %847 = vmatpush1.msra.mxu0 %v600_v36  ;;  %v560_v35 = vunpack.c.l.bf16 %v234_v24  ;;  %v314_v36 = vunpack.c.l.bf16 %v111_v25  ;;  %v557_v39 = vunpack.c.h.bf16 %v232_v31  ;;  %v155_v24 = vld [vmem:[#allocation5 + $0x198] sm:$0xff] }
  0x90   :  { %985 = vmatpush1.msra.mxu1 %v354_v37  ;;  %848 = vmatprep.subr.mxu0 %v597_v40  ;;  %v294_v37 = vld [vmem:[#allocation5 + $0x5f0] sm:$0xff]  ;;  %v311_v40 = vunpack.c.h.bf16 %v109_v32 }
  0x91   :  { %986 = vmatprep.subr.mxu1 %v351_v41  ;;  %849 = vmatpush1.msra.mxu0 %v596_v42  ;;  %v556_v41 = vunpack.c.l.bf16 %v232_v31  ;;  %v310_v42 = vunpack.c.l.bf16 %v109_v32  ;;  %v681_v45 = vunpack.c.h.bf16 %v294_v37  ;;  %v153_v31 = vld [vmem:[#allocation5 + $0x188] sm:$0xff] }
  0x92   :  { %987 = vmatpush1.msra.mxu1 %v350_v43  ;;  %850 = vmatprep.subr.mxu0 %v593_v46  ;;  %v292_v43 = vld [vmem:[#allocation5 + $0x5e0] sm:$0xff]  ;;  %v307_v46 = vunpack.c.h.bf16 %v107_v38 }
  0x93   :  { %988 = vmatprep.subr.mxu1 %v347_v47  ;;  %851 = vmatpush1.msra.mxu0 %v592_v48  ;;  %v680_v47 = vunpack.c.l.bf16 %v294_v37  ;;  %v306_v48 = vunpack.c.l.bf16 %v107_v38  ;;  %v677_v51 = vunpack.c.h.bf16 %v292_v43  ;;  %v151_v37 = vld [vmem:[#allocation5 + $0x178] sm:$0xff] }
  0x94   :  { %989 = vmatpush1.msra.mxu1 %v346_v49  ;;  %852 = vmatprep.subr.mxu0 %v589_v52  ;;  %v290_v49 = vld [vmem:[#allocation5 + $0x5d0] sm:$0xff]  ;;  %v303_v52 = vunpack.c.h.bf16 %v105_v44 }
  0x95   :  { %990 = vmatprep.subr.mxu1 %v343_v53  ;;  %853 = vmatpush1.msra.mxu0 %v588_v54  ;;  %v676_v53 = vunpack.c.l.bf16 %v292_v43  ;;  %v302_v54 = vunpack.c.l.bf16 %v105_v44  ;;  %v673_v57 = vunpack.c.h.bf16 %v290_v49  ;;  %v149_v43 = vld [vmem:[#allocation5 + $0x168] sm:$0xff] }
  0x96   :  { %991 = vmatpush1.msra.mxu1 %v342_v55  ;;  %854 = vmatprep.subr.mxu0 %v585_v58  ;;  %v288_v55 = vld [vmem:[#allocation5 + $0x5c0] sm:$0xff]  ;;  %v427_v58 = vunpack.c.h.bf16 %v167_v50 }
  0x97   :  { %992 = vmatprep.subr.mxu1 %v339_v59  ;;  %855 = vmatpush1.msra.mxu0 %v584_v60  ;;  %v672_v59 = vunpack.c.l.bf16 %v290_v49  ;;  %v426_v60 = vunpack.c.l.bf16 %v167_v50  ;;  %v669_v63 = vunpack.c.h.bf16 %v288_v55  ;;  %v147_v49 = vld [vmem:[#allocation5 + $0x158] sm:$0xff] }
  0x98   :  { %993 = vmatpush1.msra.mxu1 %v338_v61  ;;  %856 = vmatprep.subr.mxu0 %v581_v0  ;;  %v286_v61 = vld [vmem:[#allocation5 + $0x5b0] sm:$0xff]  ;;  %v423_v0 = vunpack.c.h.bf16 %v165_v56 }
  0x99   :  { %994 = vmatprep.subr.mxu1 %v335_v2  ;;  %857 = vmatpush1.msra.mxu0 %v580_v3  ;;  %v668_v2 = vunpack.c.l.bf16 %v288_v55  ;;  %v422_v3 = vunpack.c.l.bf16 %v165_v56  ;;  %v665_v7 = vunpack.c.h.bf16 %v286_v61  ;;  %v145_v55 = vld [vmem:[#allocation5 + $0x148] sm:$0xff] }
  0x9a   :  { %995 = vmatpush1.msra.mxu1 %v334_v4  ;;  %858 = vmatprep.subr.mxu0 %v577_v8  ;;  %v284_v4 = vld [vmem:[#allocation5 + $0x5a0] sm:$0xff]  ;;  %v419_v8 = vunpack.c.h.bf16 %v163_v62 }
  0x9b   :  { %996 = vmatprep.subr.mxu1 %v331_v9  ;;  %859 = vmatpush1.msra.mxu0 %v576_v10  ;;  %v664_v9 = vunpack.c.l.bf16 %v286_v61  ;;  %v418_v10 = vunpack.c.l.bf16 %v163_v62  ;;  %v661_v13 = vunpack.c.h.bf16 %v284_v4  ;;  %v143_v61 = vld [vmem:[#allocation5 + $0x138] sm:$0xff] }
  0x9c   :  { %997 = vmatpush1.msra.mxu1 %v330_v11  ;;  %860 = vmatprep.subr.mxu0 %v573_v14  ;;  %v282_v11 = vld [vmem:[#allocation5 + $0x590] sm:$0xff]  ;;  %v415_v14 = vunpack.c.h.bf16 %v161_v5 }
  0x9d   :  { %998 = vmatprep.subr.mxu1 %v327_v15  ;;  %861 = vmatpush1.msra.mxu0 %v572_v16  ;;  %v660_v15 = vunpack.c.l.bf16 %v284_v4  ;;  %v414_v16 = vunpack.c.l.bf16 %v161_v5  ;;  %v657_v19 = vunpack.c.h.bf16 %v282_v11  ;;  %v141_v4 = vld [vmem:[#allocation5 + $0x128] sm:$0xff] }
  0x9e   :  { %999 = vmatpush1.msra.mxu1 %v326_v17  ;;  %862 = vmatprep.subr.mxu0 %v569_v20  ;;  %v280_v17 = vld [vmem:[#allocation5 + $0x580] sm:$0xff]  ;;  %v411_v20 = vunpack.c.h.bf16 %v159_v12 }
  0x9f   :  { %1000 = vmatprep.subr.mxu1 %v323_v21  ;;  %863 = vmatpush1.msra.mxu0 %v568_v22  ;;  %v656_v21 = vunpack.c.l.bf16 %v282_v11  ;;  %v410_v22 = vunpack.c.l.bf16 %v159_v12  ;;  %v653_v25 = vunpack.c.h.bf16 %v280_v17  ;;  %v375_v11 = vunpack.c.h.bf16 %v141_v4  ;;  %v139_v12 = vld [vmem:[#allocation5 + $0x118] sm:$0xff] }
  0xa0   :  { %1001 = vmatpush1.msra.mxu1 %v322_v23  ;;  %864 = vmatprep.subr.mxu0 %v565_v26  ;;  %v278_v23 = vld [vmem:[#allocation5 + $0x570] sm:$0xff]  ;;  %v407_v26 = vunpack.c.h.bf16 %v157_v18 }
  0xa1   :  { %1002 = vmatprep.subr.mxu1 %v319_v27  ;;  %865 = vmatpush1.msra.mxu0 %v564_v28  ;;  %v652_v27 = vunpack.c.l.bf16 %v280_v17  ;;  %v406_v28 = vunpack.c.l.bf16 %v157_v18  ;;  %v649_v32 = vunpack.c.h.bf16 %v278_v23  ;;  %v137_v17 = vld [vmem:[#allocation5 + $0x108] sm:$0xff] }
  0xa2   :  { %1003 = vmatpush1.msra.mxu1 %v318_v30  ;;  %866 = vmatprep.subr.mxu0 %v561_v33  ;;  %v276_v30 = vld [vmem:[#allocation5 + $0x560] sm:$0xff]  ;;  %v403_v33 = vunpack.c.h.bf16 %v155_v24  ;;  %v197_v18 = vld [vmem:[#allocation5 + $0x2e8] sm:$0xff] }
  0xa3   :  { %1004 = vmatprep.subr.mxu1 %v315_v34  ;;  %867 = vmatpush1.msra.mxu0 %v560_v35  ;;  %v648_v34 = vunpack.c.l.bf16 %v278_v23  ;;  %v402_v35 = vunpack.c.l.bf16 %v155_v24  ;;  %v645_v38 = vunpack.c.h.bf16 %v276_v30  ;;  %v367_v24 = vunpack.c.h.bf16 %v137_v17 }
  0xa4   :  { %1005 = vmatpush1.msra.mxu1 %v314_v36  ;;  %868 = vmatprep.subr.mxu0 %v557_v39  ;;  %v274_v36 = vld [vmem:[#allocation5 + $0x550] sm:$0xff]  ;;  %v399_v39 = vunpack.c.h.bf16 %v153_v31 }
  0xa5   :  { %1006 = vmatprep.subr.mxu1 %v311_v40  ;;  %869 = vmatpush1.msra.mxu0 %v556_v41  ;;  %v644_v40 = vunpack.c.l.bf16 %v276_v30  ;;  %v398_v41 = vunpack.c.l.bf16 %v153_v31  ;;  %v641_v44 = vunpack.c.h.bf16 %v274_v36  ;;  %v486_v30 = vunpack.c.l.bf16 %v197_v18  ;;  %v193_v31 = vld [vmem:[#allocation5 + $0x2c8] sm:$0xff] }
  0xa6   :  { %1007 = vmatpush1.msra.mxu1 %v310_v42  ;;  %870 = vmatprep.subr.mxu0 %v681_v45  ;;  %v272_v42 = vld [vmem:[#allocation5 + $0x540] sm:$0xff]  ;;  %v395_v45 = vunpack.c.h.bf16 %v151_v37 }
  0xa7   :  { %1008 = vmatprep.subr.mxu1 %v307_v46  ;;  %871 = vmatpush2.msra.mxu0 %v680_v47  ;;  %v640_v46 = vunpack.c.l.bf16 %v274_v36  ;;  %v394_v47 = vunpack.c.l.bf16 %v151_v37  ;;  %v637_v50 = vunpack.c.h.bf16 %v272_v42  ;;  %v191_v37 = vld [vmem:[#allocation5 + $0x2b8] sm:$0xff] }
  0xa8   :  { %1009 = vmatpush1.msra.mxu1 %v306_v48  ;;  %872 = vmatprep.subr.mxu0 %v677_v51  ;;  %v270_v48 = vld [vmem:[#allocation5 + $0x530] sm:$0xff]  ;;  %v391_v51 = vunpack.c.h.bf16 %v149_v43 }
  0xa9   :  { %1010 = vmatprep.subr.mxu1 %v303_v52  ;;  %873 = vmatpush2.msra.mxu0 %v676_v53  ;;  %v636_v52 = vunpack.c.l.bf16 %v272_v42  ;;  %v390_v53 = vunpack.c.l.bf16 %v149_v43  ;;  %v633_v56 = vunpack.c.h.bf16 %v270_v48  ;;  %v189_v43 = vld [vmem:[#allocation5 + $0x2a8] sm:$0xff] }
  0xaa   :  { %1011 = vmatpush1.msra.mxu1 %v302_v54  ;;  %874 = vmatprep.subr.mxu0 %v673_v57  ;;  %v268_v54 = vld [vmem:[#allocation5 + $0x520] sm:$0xff]  ;;  %v387_v57 = vunpack.c.h.bf16 %v147_v49 }
  0xab   :  { %1012 = vmatprep.subr.mxu1 %v427_v58  ;;  %875 = vmatpush2.msra.mxu0 %v672_v59  ;;  %v632_v58 = vunpack.c.l.bf16 %v270_v48  ;;  %v386_v59 = vunpack.c.l.bf16 %v147_v49  ;;  %v629_v62 = vunpack.c.h.bf16 %v268_v54  ;;  %v187_v49 = vld [vmem:[#allocation5 + $0x298] sm:$0xff] }
  0xac   :  { %1013 = vmatpush2.msra.mxu1 %v426_v60  ;;  %876 = vmatprep.subr.mxu0 %v669_v63  ;;  %v266_v60 = vld [vmem:[#allocation5 + $0x510] sm:$0xff]  ;;  %v383_v63 = vunpack.c.h.bf16 %v145_v55 }
  0xad   :  { %1014 = vmatprep.subr.mxu1 %v423_v0  ;;  %877 = vmatpush2.msra.mxu0 %v668_v2  ;;  %v628_v0 = vunpack.c.l.bf16 %v268_v54  ;;  %v382_v2 = vunpack.c.l.bf16 %v145_v55  ;;  %v625_v5 = vunpack.c.h.bf16 %v266_v60  ;;  %v253_v54 = vld [vmem:[#allocation5 + $0x4a8] sm:$0xff]  ;;  %v467_v55 = vunpack.c.h.bf16 %v187_v49 }
  0xae   :  { %1015 = vmatpush2.msra.mxu1 %v422_v3  ;;  %878 = vmatprep.subr.mxu0 %v665_v7  ;;  %v264_v3 = vld [vmem:[#allocation5 + $0x500] sm:$0xff]  ;;  %v379_v7 = vunpack.c.h.bf16 %v143_v61 }
  0xaf   :  { %1016 = vmatprep.subr.mxu1 %v419_v8  ;;  %879 = vmatpush2.msra.mxu0 %v664_v9  ;;  %v624_v8 = vunpack.c.l.bf16 %v266_v60  ;;  %v378_v9 = vunpack.c.l.bf16 %v143_v61  ;;  %v251_v60 = vld [vmem:[#allocation5 + $0x498] sm:$0xff] }
  0xb0   :  { %1017 = vmatpush2.msra.mxu1 %v418_v10  ;;  %880 = vmatprep.subr.mxu0 %v661_v13  ;;  %v621_v10 = vunpack.c.h.bf16 %v264_v3  ;;  %v199_v13 = vld [vmem:[#allocation5 + $0x2f8] sm:$0xff] }
  0xb1   :  { %1018 = vmatprep.subr.mxu1 %v415_v14  ;;  %881 = vmatpush2.msra.mxu0 %v660_v15  ;;  %v620_v14 = vunpack.c.l.bf16 %v264_v3  ;;  %v374_v15 = vunpack.c.l.bf16 %v141_v4  ;;  %v490_v23 = vunpack.c.l.bf16 %v199_v13  ;;  %v249_v3 = vld [vmem:[#allocation5 + $0x488] sm:$0xff] }
  0xb2   :  { %1019 = vmatpush2.msra.mxu1 %v414_v16  ;;  %882 = vmatprep.subr.mxu0 %v657_v19  ;;  %v2427_v16 = vld [vmem:[#allocation2 + $0x28] sm:$0xff]  ;;  %v2429_v19 = vld [vmem:[#allocation2 + $0x20] sm:$0xff] }
  0xb3   :  { %1020 = vmatprep.subr.mxu1 %v411_v20  ;;  %883 = vmatpush2.msra.mxu0 %v656_v21  ;;  %v371_v20 = vunpack.c.h.bf16 %v139_v12  ;;  %v491_v21 = vunpack.c.h.bf16 %v199_v13 }
  0xb4   :  { %1021 = vmatpush2.msra.mxu1 %v410_v22  ;;  %884 = vmatprep.subr.mxu0 %v653_v25  ;;  %v370_v22 = vunpack.c.l.bf16 %v139_v12  ;;  %v487_v25 = vunpack.c.h.bf16 %v197_v18  ;;  %v591_v12 = vunpack.c.h.bf16 %v249_v3 }
  0xb5   :  { %1022 = vmatprep.subr.mxu1 %v407_v26  ;;  %885 = vmatpush2.msra.mxu0 %v652_v27  ;;  %v195_v26 = vld [vmem:[#allocation5 + $0x2d8] sm:$0xff] }
  0xb6   :  { %1023 = vmatpush2.msra.mxu1 %v406_v28  ;;  %886 = vmatprep.subr.mxu0 %v649_v32  ;;  %v263_v27 = vld [vmem:[#allocation5 + $0x4f8] sm:$0xff]  ;;  %v366_v28 = vunpack.c.l.bf16 %v137_v17  ;;  %v261_v32 = vld [vmem:[#allocation5 + $0x4e8] sm:$0xff] }
  0xb7   :  { %1024 = vmatprep.subr.mxu1 %v403_v33  ;;  %887 = vmatpush2.msra.mxu0 %v648_v34  ;;  %v483_v33 = vunpack.c.h.bf16 %v195_v26  ;;  %v619_v34 = vunpack.c.h.bf16 %v263_v27  ;;  %v618_v36 = vunpack.c.l.bf16 %v263_v27  ;;  %v614_v42 = vunpack.c.l.bf16 %v261_v32  ;;  %v245_v17 = vld [vmem:[#allocation5 + $0x468] sm:$0xff] }
  0xb8   :  { %1025 = vmatpush2.msra.mxu1 %v402_v35  ;;  %888 = vmatprep.subr.mxu0 %v645_v38  ;;  %v482_v35 = vunpack.c.l.bf16 %v195_v26  ;;  %v259_v38 = vld [vmem:[#allocation5 + $0x4d8] sm:$0xff]  ;;  %v583_v26 = vunpack.c.h.bf16 %v245_v17 }
  0xb9   :  { %1026 = vmatprep.subr.mxu1 %v399_v39  ;;  %889 = vmatpush2.msra.mxu0 %v644_v40  ;;  %v479_v39 = vunpack.c.h.bf16 %v193_v31  ;;  %v615_v40 = vunpack.c.h.bf16 %v261_v32  ;;  %v610_v48 = vunpack.c.l.bf16 %v259_v38 }
  0xba   :  { %1027 = vmatpush2.msra.mxu1 %v398_v41  ;;  %890 = vmatprep.subr.mxu0 %v641_v44  ;;  %v478_v41 = vunpack.c.l.bf16 %v193_v31  ;;  %v257_v44 = vld [vmem:[#allocation5 + $0x4c8] sm:$0xff] }
  0xbb   :  { %1028 = vmatprep.subr.mxu1 %v395_v45  ;;  %891 = vmatpush2.msra.mxu0 %v640_v46  ;;  %v475_v45 = vunpack.c.h.bf16 %v191_v37  ;;  %v611_v46 = vunpack.c.h.bf16 %v259_v38  ;;  %v241_v31 = vld [vmem:[#allocation5 + $0x448] sm:$0xff] }
  0xbc   :  { %1029 = vmatpush2.msra.mxu1 %v394_v47  ;;  %892 = vmatprep.subr.mxu0 %v637_v50  ;;  %v474_v47 = vunpack.c.l.bf16 %v191_v37  ;;  %v255_v50 = vld [vmem:[#allocation5 + $0x4b8] sm:$0xff] }
  0xbd   :  { %1030 = vmatprep.subr.mxu1 %v391_v51  ;;  %893 = vmatpush2.msra.mxu0 %v636_v52  ;;  %v607_v51 = vunpack.c.h.bf16 %v257_v44  ;;  %v606_v52 = vunpack.c.l.bf16 %v257_v44  ;;  %v239_v37 = vld [vmem:[#allocation5 + $0x438] sm:$0xff] }
  0xbe   :  { %1031 = vmatpush2.msra.mxu1 %v390_v53  ;;  %894 = vmatprep.subr.mxu0 %v633_v56  ;;  %v185_v53 = vld [vmem:[#allocation5 + $0x288] sm:$0xff]  ;;  %v603_v56 = vunpack.c.h.bf16 %v255_v50 }
  0xbf   :  { %1032 = vmatprep.subr.mxu1 %v387_v57  ;;  %895 = vmatpush2.msra.mxu0 %v632_v58  ;;  %v466_v57 = vunpack.c.l.bf16 %v187_v49  ;;  %v602_v58 = vunpack.c.l.bf16 %v255_v50  ;;  %v463_v61 = vunpack.c.h.bf16 %v185_v53  ;;  %v235_v49 = vld [vmem:[#allocation5 + $0x418] sm:$0xff] }
  0xc0   :  { %1033 = vmatpush2.msra.mxu1 %v386_v59  ;;  %896 = vmatprep.subr.mxu0 %v629_v62  ;;  %v183_v59 = vld [vmem:[#allocation5 + $0x278] sm:$0xff]  ;;  %v599_v62 = vunpack.c.h.bf16 %v253_v54 }
  0xc1   :  { %1034 = vmatprep.subr.mxu1 %v383_v63  ;;  %897 = vmatpush2.msra.mxu0 %v628_v0  ;;  %v462_v63 = vunpack.c.l.bf16 %v185_v53  ;;  %v598_v0 = vunpack.c.l.bf16 %v253_v54  ;;  %v459_v4 = vunpack.c.h.bf16 %v183_v59  ;;  %v233_v53 = vld [vmem:[#allocation5 + $0x408] sm:$0xff] }
  0xc2   :  { %1035 = vmatpush2.msra.mxu1 %v382_v2  ;;  %898 = vmatprep.subr.mxu0 %v625_v5  ;;  %v181_v2 = vld [vmem:[#allocation5 + $0x268] sm:$0xff]  ;;  %v595_v5 = vunpack.c.h.bf16 %v251_v60 }
  0xc3   :  { %1036 = vmatprep.subr.mxu1 %v379_v7  ;;  %899 = vmatpush2.msra.mxu0 %v624_v8  ;;  %v458_v7 = vunpack.c.l.bf16 %v183_v59  ;;  %v594_v8 = vunpack.c.l.bf16 %v251_v60  ;;  %v454_v13 = vunpack.c.l.bf16 %v181_v2  ;;  %v295_v59 = vld [vmem:[#allocation5 + $0x5f8] sm:$0xff] }
  0xc4   :  { %1037 = vmatpush2.msra.mxu1 %v378_v9  ;;  %900 = vmatprep.subr.mxu0 %v621_v10  ;;  %v179_v9 = vld [vmem:[#allocation5 + $0x258] sm:$0xff] }
  0xc5   :  { %1038 = vmatprep.subr.mxu1 %v375_v11  ;;  %901 = vmatpush2.msra.mxu0 %v620_v14  ;;  %v247_v10 = vld [vmem:[#allocation5 + $0x478] sm:$0xff]  ;;  %v455_v11 = vunpack.c.h.bf16 %v181_v2  ;;  %v590_v14 = vunpack.c.l.bf16 %v249_v3  ;;  %v451_v18 = vunpack.c.h.bf16 %v179_v9  ;;  %v293_v2 = vld [vmem:[#allocation5 + $0x5e8] sm:$0xff] }
  0xc6   :  { %902 = vmatprep.mubr.f32.mxu0 %v2427_v16  ;;  %1039 = vmatpush2.msra.mxu1 %v374_v15  ;;  %v177_v15 = vld [vmem:[#allocation5 + $0x248] sm:$0xff] }
  0xc7   :  { %903 = vmatmul.mubr.f32.vlgmr.msra.gmra.mxu0 %v2429_v19  ;;  %1040 = vmatprep.subr.mxu1 %v371_v20  ;;  %v587_v20 = vunpack.c.h.bf16 %v247_v10  ;;  %v446_v27 = vunpack.c.l.bf16 %v177_v15 }
  0xc8   :  { %1051 = vmatprep.subr.mxu0 %v491_v21  ;;  %1041 = vmatpush2.msra.mxu1 %v370_v22  ;;  %v450_v21 = vunpack.c.l.bf16 %v179_v9  ;;  %v586_v22 = vunpack.c.l.bf16 %v247_v10  ;;  %v291_v9 = vld [vmem:[#allocation5 + $0x5d8] sm:$0xff] }
  0xc9   :  { %1052 = vmatpush1.msra.mxu0 %v490_v23  ;;  %1042 = vmatprep.subr.mxu1 %v367_v24  ;;  %v175_v23 = vld [vmem:[#allocation5 + $0x238] sm:$0xff] }
  0xca   :  { %1053 = vmatprep.subr.mxu0 %v487_v25  ;;  %1043 = vmatpush2.msra.mxu1 %v366_v28  ;;  %v243_v24 = vld [vmem:[#allocation5 + $0x458] sm:$0xff]  ;;  %v447_v25 = vunpack.c.h.bf16 %v177_v15  ;;  %v582_v28 = vunpack.c.l.bf16 %v245_v17  ;;  %v443_v32 = vunpack.c.h.bf16 %v175_v23  ;;  %v289_v15 = vld [vmem:[#allocation5 + $0x5c8] sm:$0xff] }
  0xcb   :  { %1044 = vmatprep.mubr.f32.mxu1 %v2419_v1  ;;  %1054 = vmatpush1.msra.mxu0 %v486_v30  ;;  %v471_v1 = vunpack.c.h.bf16 %v189_v43  ;;  %v173_v30 = vld [vmem:[#allocation5 + $0x228] sm:$0xff] }
  0xcc   :  { %1045 = vmatmul.mubr.f32.vlgmr.msra.gmra.mxu1 %v2421_v6  ;;  %1055 = vmatprep.subr.mxu0 %v483_v33  ;;  %v470_v6 = vunpack.c.l.bf16 %v189_v43  ;;  %v579_v33 = vunpack.c.h.bf16 %v243_v24  ;;  %v439_v38 = vunpack.c.h.bf16 %v173_v30  ;;  %v237_v43 = vld [vmem:[#allocation5 + $0x428] sm:$0xff] }
  0xcd   :  { %1122 = vmatprep.subr.mxu1 %v619_v34  ;;  %1056 = vmatpush1.msra.mxu0 %v482_v35  ;;  %v442_v34 = vunpack.c.l.bf16 %v175_v23  ;;  %v578_v35 = vunpack.c.l.bf16 %v243_v24  ;;  %v287_v23 = vld [vmem:[#allocation5 + $0x5b8] sm:$0xff] }
  0xce   :  { %1123 = vmatpush1.msra.mxu1 %v618_v36  ;;  %1057 = vmatprep.subr.mxu0 %v479_v39  ;;  %v171_v36 = vld [vmem:[#allocation5 + $0x218] sm:$0xff]  ;;  %v575_v39 = vunpack.c.h.bf16 %v241_v31 }
  0xcf   :  { %1124 = vmatprep.subr.mxu1 %v615_v40  ;;  %1058 = vmatpush1.msra.mxu0 %v478_v41  ;;  %v438_v40 = vunpack.c.l.bf16 %v173_v30  ;;  %v574_v41 = vunpack.c.l.bf16 %v241_v31  ;;  %v435_v44 = vunpack.c.h.bf16 %v171_v36  ;;  %v285_v30 = vld [vmem:[#allocation5 + $0x5a8] sm:$0xff] }
  0xd0   :  { %1125 = vmatpush1.msra.mxu1 %v614_v42  ;;  %1059 = vmatprep.subr.mxu0 %v475_v45  ;;  %v169_v42 = vld [vmem:[#allocation5 + $0x208] sm:$0xff]  ;;  %v571_v45 = vunpack.c.h.bf16 %v239_v37 }
  0xd1   :  { %1126 = vmatprep.subr.mxu1 %v611_v46  ;;  %1060 = vmatpush1.msra.mxu0 %v474_v47  ;;  %v434_v46 = vunpack.c.l.bf16 %v171_v36  ;;  %v570_v47 = vunpack.c.l.bf16 %v239_v37  ;;  %v431_v50 = vunpack.c.h.bf16 %v169_v42  ;;  %v283_v36 = vld [vmem:[#allocation5 + $0x598] sm:$0xff] }
  0xd2   :  { %1127 = vmatpush1.msra.mxu1 %v610_v48  ;;  %1061 = vmatprep.subr.mxu0 %v471_v1  ;;  %v231_v48 = vld [vmem:[#allocation5 + $0x3f8] sm:$0xff]  ;;  %v567_v1 = vunpack.c.h.bf16 %v237_v43 }
  0xd3   :  { %1128 = vmatprep.subr.mxu1 %v607_v51  ;;  %1062 = vmatpush1.msra.mxu0 %v470_v6  ;;  %v430_v51 = vunpack.c.l.bf16 %v169_v42  ;;  %v566_v6 = vunpack.c.l.bf16 %v237_v43  ;;  %v555_v54 = vunpack.c.h.bf16 %v231_v48  ;;  %v281_v42 = vld [vmem:[#allocation5 + $0x588] sm:$0xff] }
  0xd4   :  { %1129 = vmatpush1.msra.mxu1 %v606_v52  ;;  %1063 = vmatprep.subr.mxu0 %v467_v55  ;;  %v229_v52 = vld [vmem:[#allocation5 + $0x3e8] sm:$0xff]  ;;  %v563_v55 = vunpack.c.h.bf16 %v235_v49 }
  0xd5   :  { %1130 = vmatprep.subr.mxu1 %v603_v56  ;;  %1064 = vmatpush1.msra.mxu0 %v466_v57  ;;  %v554_v56 = vunpack.c.l.bf16 %v231_v48  ;;  %v562_v57 = vunpack.c.l.bf16 %v235_v49  ;;  %v551_v60 = vunpack.c.h.bf16 %v229_v52  ;;  %v279_v48 = vld [vmem:[#allocation5 + $0x578] sm:$0xff] }
  0xd6   :  { %1131 = vmatpush1.msra.mxu1 %v602_v58  ;;  %1065 = vmatprep.subr.mxu0 %v463_v61  ;;  %v227_v58 = vld [vmem:[#allocation5 + $0x3d8] sm:$0xff]  ;;  %v559_v61 = vunpack.c.h.bf16 %v233_v53 }
  0xd7   :  { %1132 = vmatprep.subr.mxu1 %v599_v62  ;;  %1066 = vmatpush1.msra.mxu0 %v462_v63  ;;  %v550_v62 = vunpack.c.l.bf16 %v229_v52  ;;  %v558_v63 = vunpack.c.l.bf16 %v233_v53  ;;  %v547_v3 = vunpack.c.h.bf16 %v227_v58  ;;  %v277_v52 = vld [vmem:[#allocation5 + $0x568] sm:$0xff] }
  0xd8   :  { %1133 = vmatpush1.msra.mxu1 %v598_v0  ;;  %1067 = vmatprep.subr.mxu0 %v459_v4  ;;  %v225_v0 = vld [vmem:[#allocation5 + $0x3c8] sm:$0xff]  ;;  %v683_v4 = vunpack.c.h.bf16 %v295_v59 }
  0xd9   :  { %1134 = vmatprep.subr.mxu1 %v595_v5  ;;  %1068 = vmatpush1.msra.mxu0 %v458_v7  ;;  %v546_v5 = vunpack.c.l.bf16 %v227_v58  ;;  %v682_v7 = vunpack.c.l.bf16 %v295_v59  ;;  %v543_v10 = vunpack.c.h.bf16 %v225_v0  ;;  %v275_v58 = vld [vmem:[#allocation5 + $0x558] sm:$0xff] }
  0xda   :  { %1135 = vmatpush1.msra.mxu1 %v594_v8  ;;  %1069 = vmatprep.subr.mxu0 %v455_v11  ;;  %v223_v8 = vld [vmem:[#allocation5 + $0x3b8] sm:$0xff]  ;;  %v679_v11 = vunpack.c.h.bf16 %v293_v2 }
  0xdb   :  { %1136 = vmatprep.subr.mxu1 %v591_v12  ;;  %1070 = vmatpush1.msra.mxu0 %v454_v13  ;;  %v542_v12 = vunpack.c.l.bf16 %v225_v0  ;;  %v678_v13 = vunpack.c.l.bf16 %v293_v2  ;;  %v539_v17 = vunpack.c.h.bf16 %v223_v8  ;;  %v273_v0 = vld [vmem:[#allocation5 + $0x548] sm:$0xff] }
  0xdc   :  { %1137 = vmatpush1.msra.mxu1 %v590_v14  ;;  %1071 = vmatprep.subr.mxu0 %v451_v18  ;;  %v221_v14 = vld [vmem:[#allocation5 + $0x3a8] sm:$0xff]  ;;  %v675_v18 = vunpack.c.h.bf16 %v291_v9 }
  0xdd   :  { %1138 = vmatprep.subr.mxu1 %v587_v20  ;;  %1072 = vmatpush1.msra.mxu0 %v450_v21  ;;  %v538_v20 = vunpack.c.l.bf16 %v223_v8  ;;  %v674_v21 = vunpack.c.l.bf16 %v291_v9  ;;  %v535_v24 = vunpack.c.h.bf16 %v221_v14  ;;  %v271_v8 = vld [vmem:[#allocation5 + $0x538] sm:$0xff] }
  0xde   :  { %1139 = vmatpush1.msra.mxu1 %v586_v22  ;;  %1073 = vmatprep.subr.mxu0 %v447_v25  ;;  %v219_v22 = vld [vmem:[#allocation5 + $0x398] sm:$0xff]  ;;  %v671_v25 = vunpack.c.h.bf16 %v289_v15 }
  0xdf   :  { %1140 = vmatprep.subr.mxu1 %v583_v26  ;;  %1074 = vmatpush1.msra.mxu0 %v446_v27  ;;  %v534_v26 = vunpack.c.l.bf16 %v221_v14  ;;  %v670_v27 = vunpack.c.l.bf16 %v289_v15  ;;  %v531_v31 = vunpack.c.h.bf16 %v219_v22  ;;  %v269_v14 = vld [vmem:[#allocation5 + $0x528] sm:$0xff] }
  0xe0   :  { %1141 = vmatpush1.msra.mxu1 %v582_v28  ;;  %1075 = vmatprep.subr.mxu0 %v443_v32  ;;  %v217_v28 = vld [vmem:[#allocation5 + $0x388] sm:$0xff]  ;;  %v667_v32 = vunpack.c.h.bf16 %v287_v23 }
  0xe1   :  { %1142 = vmatprep.subr.mxu1 %v579_v33  ;;  %1076 = vmatpush1.msra.mxu0 %v442_v34  ;;  %v530_v33 = vunpack.c.l.bf16 %v219_v22  ;;  %v666_v34 = vunpack.c.l.bf16 %v287_v23  ;;  %v527_v37 = vunpack.c.h.bf16 %v217_v28  ;;  %v631_v22 = vunpack.c.h.bf16 %v269_v14  ;;  %v267_v23 = vld [vmem:[#allocation5 + $0x518] sm:$0xff] }
  0xe2   :  { %1143 = vmatpush1.msra.mxu1 %v578_v35  ;;  %1077 = vmatprep.subr.mxu0 %v439_v38  ;;  %v215_v35 = vld [vmem:[#allocation5 + $0x378] sm:$0xff]  ;;  %v663_v38 = vunpack.c.h.bf16 %v285_v30 }
  0xe3   :  { %1144 = vmatprep.subr.mxu1 %v575_v39  ;;  %1078 = vmatpush1.msra.mxu0 %v438_v40  ;;  %v526_v39 = vunpack.c.l.bf16 %v217_v28  ;;  %v662_v40 = vunpack.c.l.bf16 %v285_v30  ;;  %v523_v43 = vunpack.c.h.bf16 %v215_v35  ;;  %v626_v28 = vunpack.c.l.bf16 %v267_v23  ;;  %v299_v30 = vld [vmem:[#allocation5 + $0x618] sm:$0xff] }
  0xe4   :  { %1145 = vmatpush1.msra.mxu1 %v574_v41  ;;  %1079 = vmatprep.subr.mxu0 %v435_v44  ;;  %v213_v41 = vld [vmem:[#allocation5 + $0x368] sm:$0xff]  ;;  %v659_v44 = vunpack.c.h.bf16 %v283_v36 }
  0xe5   :  { %1146 = vmatprep.subr.mxu1 %v571_v45  ;;  %1080 = vmatpush1.msra.mxu0 %v434_v46  ;;  %v522_v45 = vunpack.c.l.bf16 %v215_v35  ;;  %v658_v46 = vunpack.c.l.bf16 %v283_v36  ;;  %v519_v49 = vunpack.c.h.bf16 %v213_v41  ;;  %v297_v35 = vld [vmem:[#allocation5 + $0x608] sm:$0xff]  ;;  %v691_v36 = vunpack.c.h.bf16 %v299_v30 }
  0xe6   :  { %1147 = vmatpush1.msra.mxu1 %v570_v47  ;;  %1081 = vmatprep.subr.mxu0 %v431_v50  ;;  %v211_v47 = vld [vmem:[#allocation5 + $0x358] sm:$0xff]  ;;  %v655_v50 = vunpack.c.h.bf16 %v281_v42 }
  0xe7   :  { %1148 = vmatprep.subr.mxu1 %v567_v1  ;;  %1082 = vmatpush1.msra.mxu0 %v430_v51  ;;  %v518_v1 = vunpack.c.l.bf16 %v213_v41  ;;  %v654_v51 = vunpack.c.l.bf16 %v281_v42  ;;  %v515_v53 = vunpack.c.h.bf16 %v211_v47  ;;  %v1472_v41 = vld [vmem:[#allocation8 + $0x78] sm:$0xff] }
  0xe8   :  { %1149 = vmatpush1.msra.mxu1 %v566_v6  ;;  %1083 = vmatprep.subr.mxu0 %v555_v54  ;;  %v209_v6 = vld [vmem:[#allocation5 + $0x348] sm:$0xff]  ;;  %v651_v54 = vunpack.c.h.bf16 %v279_v48  ;;  %v1552_v42 = vunpack.c.h.bf16 %v1472_v41 }
  0xe9   :  { %1150 = vmatprep.subr.mxu1 %v563_v55  ;;  %1084 = vmatpush2.msra.mxu0 %v554_v56  ;;  %v514_v55 = vunpack.c.l.bf16 %v211_v47  ;;  %v650_v56 = vunpack.c.l.bf16 %v279_v48  ;;  %v511_v59 = vunpack.c.h.bf16 %v209_v6  ;;  %v1503_v47 = vld [vmem:[#allocation8 + $0x170] sm:$0xff] }
  0xea   :  { %1151 = vmatpush1.msra.mxu1 %v562_v57  ;;  %1085 = vmatprep.subr.mxu0 %v551_v60  ;;  %v207_v57 = vld [vmem:[#allocation5 + $0x338] sm:$0xff]  ;;  %v647_v60 = vunpack.c.h.bf16 %v277_v52  ;;  %v1614_v48 = vunpack.c.h.bf16 %v1503_v47 }
  0xeb   :  { %1152 = vmatprep.subr.mxu1 %v559_v61  ;;  %1086 = vmatpush2.msra.mxu0 %v550_v62  ;;  %v510_v61 = vunpack.c.l.bf16 %v209_v6  ;;  %v646_v62 = vunpack.c.l.bf16 %v277_v52  ;;  %v507_v2 = vunpack.c.h.bf16 %v207_v57 }
  0xec   :  { %1153 = vmatpush1.msra.mxu1 %v558_v63  ;;  %1087 = vmatprep.subr.mxu0 %v547_v3  ;;  %v205_v63 = vld [vmem:[#allocation5 + $0x328] sm:$0xff]  ;;  %v643_v3 = vunpack.c.h.bf16 %v275_v58 }
  0xed   :  { %1154 = vmatprep.subr.mxu1 %v683_v4  ;;  %1088 = vmatpush2.msra.mxu0 %v546_v5  ;;  %v506_v4 = vunpack.c.l.bf16 %v207_v57  ;;  %v642_v5 = vunpack.c.l.bf16 %v275_v58  ;;  %v503_v9 = vunpack.c.h.bf16 %v205_v63 }
  0xee   :  { %1155 = vmatpush2.msra.mxu1 %v682_v7  ;;  %1089 = vmatprep.subr.mxu0 %v543_v10  ;;  %v203_v7 = vld [vmem:[#allocation5 + $0x318] sm:$0xff]  ;;  %v639_v10 = vunpack.c.h.bf16 %v273_v0 }
  0xef   :  { %1156 = vmatprep.subr.mxu1 %v679_v11  ;;  %1090 = vmatpush2.msra.mxu0 %v542_v12  ;;  %v502_v11 = vunpack.c.l.bf16 %v205_v63  ;;  %v638_v12 = vunpack.c.l.bf16 %v273_v0  ;;  %v499_v15 = vunpack.c.h.bf16 %v203_v7 }
  0xf0   :  { %1157 = vmatpush2.msra.mxu1 %v678_v13  ;;  %1091 = vmatprep.subr.mxu0 %v539_v17  ;;  %v201_v13 = vld [vmem:[#allocation5 + $0x308] sm:$0xff]  ;;  %v635_v17 = vunpack.c.h.bf16 %v271_v8 }
  0xf1   :  { %1158 = vmatprep.subr.mxu1 %v675_v18  ;;  %1092 = vmatpush2.msra.mxu0 %v538_v20  ;;  %v498_v18 = vunpack.c.l.bf16 %v203_v7  ;;  %v634_v20 = vunpack.c.l.bf16 %v271_v8 }
  0xf2   :  { %1159 = vmatpush2.msra.mxu1 %v674_v21  ;;  %1093 = vmatprep.subr.mxu0 %v535_v24  ;;  %v495_v21 = vunpack.c.h.bf16 %v201_v13  ;;  %v494_v24 = vunpack.c.l.bf16 %v201_v13 }
  0xf3   :  { %1160 = vmatprep.subr.mxu1 %v671_v25  ;;  %1094 = vmatpush2.msra.mxu0 %v534_v26  ;;  %v630_v25 = vunpack.c.l.bf16 %v269_v14  ;;  %v265_v26 = vld [vmem:[#allocation5 + $0x508] sm:$0xff] }
  0xf4   :  { %1161 = vmatpush2.msra.mxu1 %v670_v27  ;;  %1095 = vmatprep.subr.mxu0 %v531_v31  ;;  %v627_v27 = vunpack.c.h.bf16 %v267_v23  ;;  %v2209_v31 = vld [vmem:[#allocation2 + $0x18] sm:$0xff] }
  0xf5   :  { %1162 = vmatprep.subr.mxu1 %v667_v32  ;;  %1096 = vmatpush2.msra.mxu0 %v530_v33  ;;  %v623_v32 = vunpack.c.h.bf16 %v265_v26  ;;  %v2210_v33 = vld [vmem:[#allocation2 + $0x10] sm:$0xff] }
  0xf6   :  { %1163 = vmatpush2.msra.mxu1 %v666_v34  ;;  %1097 = vmatprep.subr.mxu0 %v527_v37  ;;  %v622_v34 = vunpack.c.l.bf16 %v265_v26  ;;  %v690_v37 = vunpack.c.l.bf16 %v299_v30 }
  0xf7   :  { %1164 = vmatprep.subr.mxu1 %v663_v38  ;;  %1098 = vmatpush2.msra.mxu0 %v526_v39  ;;  %v687_v38 = vunpack.c.h.bf16 %v297_v35  ;;  %v686_v39 = vunpack.c.l.bf16 %v297_v35 }
  0xf8   :  { %1165 = vmatpush2.msra.mxu1 %v662_v40  ;;  %1099 = vmatprep.subr.mxu0 %v523_v43  ;;  %v2211_v40 = vld [vmem:[#allocation2 + $0x30] sm:$0xff] }
  0xf9   :  { %1166 = vmatprep.subr.mxu1 %v659_v44  ;;  %1100 = vmatpush2.msra.mxu0 %v522_v45  ;;  %v1551_v44 = vunpack.c.l.bf16 %v1472_v41 }
  0xfa   :  { %1167 = vmatpush2.msra.mxu1 %v658_v46  ;;  %1101 = vmatprep.subr.mxu0 %v519_v49  ;;  %v1471_v46 = vld [vmem:[#allocation8 + $0x70] sm:$0xff]  ;;  %v1613_v49 = vunpack.c.l.bf16 %v1503_v47 }
  0xfb   :  { %1168 = vmatprep.subr.mxu1 %v655_v50  ;;  %1102 = vmatpush2.msra.mxu0 %v518_v1  ;;  %v1470_v50 = vld [vmem:[#allocation8 + $0x68] sm:$0xff] }
  0xfc   :  { %1169 = vmatpush2.msra.mxu1 %v654_v51  ;;  %1103 = vmatprep.subr.mxu0 %v515_v53  ;;  %v1502_v1 = vld [vmem:[#allocation8 + $0x168] sm:$0xff]  ;;  %v1548_v51 = vunpack.c.h.bf16 %v1470_v50  ;;  %v1547_v52 = vunpack.c.l.bf16 %v1470_v50 }
  0xfd   :  { %1170 = vmatprep.subr.mxu1 %v651_v54  ;;  %1104 = vmatpush2.msra.mxu0 %v514_v55  ;;  %v1612_v6 = vunpack.c.h.bf16 %v1502_v1  ;;  %v1611_v53 = vunpack.c.l.bf16 %v1502_v1  ;;  %v1469_v54 = vld [vmem:[#allocation8 + $0x60] sm:$0xff] }
  0xfe   :  { %1171 = vmatpush2.msra.mxu1 %v650_v56  ;;  %1105 = vmatprep.subr.mxu0 %v511_v59  ;;  %v1501_v55 = vld [vmem:[#allocation8 + $0x160] sm:$0xff]  ;;  %v1546_v56 = vunpack.c.h.bf16 %v1469_v54  ;;  %v1545_v58 = vunpack.c.l.bf16 %v1469_v54 }
  0xff   :  { %1172 = vmatprep.subr.mxu1 %v647_v60  ;;  %1106 = vmatpush2.msra.mxu0 %v510_v61  ;;  %v1610_v57 = vunpack.c.h.bf16 %v1501_v55  ;;  %v1609_v59 = vunpack.c.l.bf16 %v1501_v55  ;;  %v1468_v60 = vld [vmem:[#allocation8 + $0x58] sm:$0xff] }
 0x100   :  { %1173 = vmatpush2.msra.mxu1 %v646_v62  ;;  %1107 = vmatprep.subr.mxu0 %v507_v2  ;;  %v1500_v61 = vld [vmem:[#allocation8 + $0x158] sm:$0xff]  ;;  %v1544_v62 = vunpack.c.h.bf16 %v1468_v60  ;;  %v1543_v0 = vunpack.c.l.bf16 %v1468_v60 }
 0x101   :  { %1174 = vmatprep.subr.mxu1 %v643_v3  ;;  %1108 = vmatpush2.msra.mxu0 %v506_v4  ;;  %v1608_v63 = vunpack.c.h.bf16 %v1500_v61  ;;  %v1607_v2 = vunpack.c.l.bf16 %v1500_v61  ;;  %v1467_v3 = vld [vmem:[#allocation8 + $0x50] sm:$0xff] }
 0x102   :  { %1175 = vmatpush2.msra.mxu1 %v642_v5  ;;  %1109 = vmatprep.subr.mxu0 %v503_v9  ;;  %v1499_v4 = vld [vmem:[#allocation8 + $0x150] sm:$0xff]  ;;  %v1542_v5 = vunpack.c.h.bf16 %v1467_v3  ;;  %v1541_v8 = vunpack.c.l.bf16 %v1467_v3 }
 0x103   :  { %1176 = vmatprep.subr.mxu1 %v639_v10  ;;  %1110 = vmatpush2.msra.mxu0 %v502_v11  ;;  %v1606_v7 = vunpack.c.h.bf16 %v1499_v4  ;;  %v1605_v9 = vunpack.c.l.bf16 %v1499_v4  ;;  %v1466_v10 = vld [vmem:[#allocation8 + $0x48] sm:$0xff] }
 0x104   :  { %1177 = vmatpush2.msra.mxu1 %v638_v12  ;;  %1111 = vmatprep.subr.mxu0 %v499_v15  ;;  %v1498_v11 = vld [vmem:[#allocation8 + $0x148] sm:$0xff]  ;;  %v1540_v12 = vunpack.c.h.bf16 %v1466_v10  ;;  %v1539_v14 = vunpack.c.l.bf16 %v1466_v10 }
 0x105   :  { %1178 = vmatprep.subr.mxu1 %v635_v17  ;;  %1112 = vmatpush2.msra.mxu0 %v498_v18  ;;  %v1604_v13 = vunpack.c.h.bf16 %v1498_v11  ;;  %v1603_v15 = vunpack.c.l.bf16 %v1498_v11  ;;  %v1465_v17 = vld [vmem:[#allocation8 + $0x40] sm:$0xff] }
 0x106   :  { %1179 = vmatpush2.msra.mxu1 %v634_v20  ;;  %1113 = vmatprep.subr.mxu0 %v495_v21  ;;  %v1497_v18 = vld [vmem:[#allocation8 + $0x140] sm:$0xff]  ;;  %v1538_v20 = vunpack.c.h.bf16 %v1465_v17 }
 0x107   :  { %1180 = vmatprep.subr.mxu1 %v631_v22  ;;  %1114 = vmatpush2.msra.mxu0 %v494_v24  ;;  %v1602_v21 = vunpack.c.h.bf16 %v1497_v18  ;;  %v1537_v22 = vunpack.c.l.bf16 %v1465_v17  ;;  %v1601_v23 = vunpack.c.l.bf16 %v1497_v18  ;;  %v1464_v24 = vld [vmem:[#allocation8 + $0x38] sm:$0xff] }
 0x108   :  { %1115 = vmatprep.mubr.f32.mxu0 %v2209_v31  ;;  %1181 = vmatpush2.msra.mxu1 %v630_v25  ;;  %v1496_v25 = vld [vmem:[#allocation8 + $0x138] sm:$0xff]  ;;  %v1536_v26 = vunpack.c.h.bf16 %v1464_v24  ;;  %v1463_v31 = vld [vmem:[#allocation8 + $0x30] sm:$0xff] }
 0x109   :  { %1116 = vmatmul.mubr.f32.vlgmr.msra.gmra.mxu0 %v2210_v33  ;;  %1182 = vmatprep.subr.mxu1 %v627_v27  ;;  %v1600_v27 = vunpack.c.h.bf16 %v1496_v25  ;;  %v1599_v30 = vunpack.c.l.bf16 %v1496_v25  ;;  %v1534_v33 = vunpack.c.h.bf16 %v1463_v31  ;;  %v1533_v35 = vunpack.c.l.bf16 %v1463_v31 }
 0x10a   :  { %1186 = vmatprep.mubr.f32.mxu1 %v2427_v16  ;;  %1183 = vmatpush2.msra.mxu1 %v626_v28  ;;  %v1504_v16 = vld [vmem:[#allocation8 + $0x178] sm:$0xff]  ;;  %v1535_v28 = vunpack.c.l.bf16 %v1464_v24 }
 0x10b   :  { %1184 = vmatprep.subr.mxu1 %v623_v32  ;;  %v1616_v43 = vunpack.c.h.bf16 %v1504_v16  ;;  %v1615_v45 = vunpack.c.l.bf16 %v1504_v16  ;;  %1649 = vmatprep.subr.mxu0 %v1552_v42  ;;  %v1495_v32 = vld [vmem:[#allocation8 + $0x130] sm:$0xff]  ;;  %v1461_v42 = vld [vmem:[#allocation8 + $0x20] sm:$0xff] }
 0x10c   :  { %1185 = vmatpush2.msra.mxu1 %v622_v34  ;;  %1650 = vmatpush1.msra.mxu0 %v1551_v44  ;;  %v1598_v34 = vunpack.c.h.bf16 %v1495_v32  ;;  %v1530_v44 = vunpack.c.h.bf16 %v1461_v42 }
 0x10d   :  { %1187 = vmatmul.mubr.f32.vlgmr.msra.gmra.mxu1 %v2429_v19  ;;  %1221 = vmatprep.subr.mxu1 %v691_v36  ;;  %v1550_v19 = vunpack.c.h.bf16 %v1471_v46  ;;  %v1597_v36 = vunpack.c.l.bf16 %v1495_v32 }
 0x10e   :  { %1222 = vmatpush1.msra.mxu1 %v690_v37  ;;  %1257 = vmatprep.mubr.f32.mxu1 %v2351_v29  ;;  %v1549_v29 = vunpack.c.l.bf16 %v1471_v46  ;;  %v1462_v37 = vld [vmem:[#allocation8 + $0x28] sm:$0xff]  ;;  %v1529_v46 = vunpack.c.l.bf16 %v1461_v42 }
 0x10f   :  { %1223 = vmatprep.subr.mxu1 %v687_v38  ;;  %1651 = vmatprep.subr.mxu0 %v1550_v19  ;;  %v1494_v38 = vld [vmem:[#allocation8 + $0x128] sm:$0xff]  ;;  %v1531_v41 = vunpack.c.l.bf16 %v1462_v37  ;;  %v1460_v19 = vld [vmem:[#allocation8 + $0x18] sm:$0xff] }
 0x110   :  { %1224 = vmatpush1.msra.mxu1 %v686_v39  ;;  %1652 = vmatpush1.msra.mxu0 %v1549_v29  ;;  %v1532_v39 = vunpack.c.h.bf16 %v1462_v37  ;;  %v1595_v16 = vunpack.c.l.bf16 %v1494_v38  ;;  %v1528_v29 = vunpack.c.h.bf16 %v1460_v19  ;;  %v1527_v50 = vunpack.c.l.bf16 %v1460_v19 }
 0x111   :  { %2063 = vmatmul.mubr.msk.f32.vlgmr.msra.gmra.mxu1 %vm692_vm0, %v2211_v40  ;;  %1720 = vmatprep.subr.mxu1 %v1616_v43  ;;  %v1596_v40 = vunpack.c.h.bf16 %v1494_v38  ;;  %v1493_v43 = vld [vmem:[#allocation8 + $0x120] sm:$0xff] }
 0x112   :  { %1721 = vmatpush1.msra.mxu1 %v1615_v45  ;;  %1653 = vmatprep.subr.mxu0 %v1548_v51  ;;  %v1594_v45 = vunpack.c.h.bf16 %v1493_v43  ;;  %v1593_v47 = vunpack.c.l.bf16 %v1493_v43  ;;  %v1459_v51 = vld [vmem:[#allocation8 + $0x10] sm:$0xff] }
 0x113   :  { %1722 = vmatprep.subr.mxu1 %v1614_v48  ;;  %1654 = vmatpush1.msra.mxu0 %v1547_v52  ;;  %v1492_v48 = vld [vmem:[#allocation8 + $0x118] sm:$0xff]  ;;  %v1526_v52 = vunpack.c.h.bf16 %v1459_v51  ;;  %v1525_v54 = vunpack.c.l.bf16 %v1459_v51 }
 0x114   :  { %1723 = vmatpush1.msra.mxu1 %v1613_v49  ;;  %1655 = vmatprep.subr.mxu0 %v1546_v56  ;;  %v1592_v49 = vunpack.c.h.bf16 %v1492_v48  ;;  %v1591_v1 = vunpack.c.l.bf16 %v1492_v48  ;;  %v1458_v56 = vld [vmem:[#allocation8 + $0x8] sm:$0xff] }
 0x115   :  { %1724 = vmatprep.subr.mxu1 %v1612_v6  ;;  %1656 = vmatpush1.msra.mxu0 %v1545_v58  ;;  %v1491_v6 = vld [vmem:[#allocation8 + $0x110] sm:$0xff]  ;;  %v1524_v58 = vunpack.c.h.bf16 %v1458_v56  ;;  %v1523_v60 = vunpack.c.l.bf16 %v1458_v56 }
 0x116   :  { %1725 = vmatpush1.msra.mxu1 %v1611_v53  ;;  %1657 = vmatprep.subr.mxu0 %v1544_v62  ;;  %v1590_v53 = vunpack.c.h.bf16 %v1491_v6  ;;  %v1589_v55 = vunpack.c.l.bf16 %v1491_v6  ;;  %v1457_v62 = vld [vmem:[#allocation8] sm:$0xff] }
 0x117   :  { %1726 = vmatprep.subr.mxu1 %v1610_v57  ;;  %1658 = vmatpush1.msra.mxu0 %v1543_v0  ;;  %v1490_v57 = vld [vmem:[#allocation8 + $0x108] sm:$0xff]  ;;  %v1522_v0 = vunpack.c.h.bf16 %v1457_v62  ;;  %v1521_v3 = vunpack.c.l.bf16 %v1457_v62 }
 0x118   :  { %1727 = vmatpush1.msra.mxu1 %v1609_v59  ;;  %1659 = vmatprep.subr.mxu0 %v1542_v5  ;;  %v1588_v59 = vunpack.c.h.bf16 %v1490_v57  ;;  %v1587_v61 = vunpack.c.l.bf16 %v1490_v57  ;;  %v1488_v5 = vld [vmem:[#allocation8 + $0xf8] sm:$0xff] }
 0x119   :  { %1728 = vmatprep.subr.mxu1 %v1608_v63  ;;  %1660 = vmatpush1.msra.mxu0 %v1541_v8  ;;  %v1489_v63 = vld [vmem:[#allocation8 + $0x100] sm:$0xff]  ;;  %v1584_v8 = vunpack.c.h.bf16 %v1488_v5  ;;  %v1583_v10 = vunpack.c.l.bf16 %v1488_v5 }
 0x11a   :  { %1729 = vmatpush1.msra.mxu1 %v1607_v2  ;;  %1661 = vmatprep.subr.mxu0 %v1540_v12  ;;  %v1586_v2 = vunpack.c.h.bf16 %v1489_v63  ;;  %v1585_v4 = vunpack.c.l.bf16 %v1489_v63  ;;  %v1487_v12 = vld [vmem:[#allocation8 + $0xf0] sm:$0xff] }
 0x11b   :  { %1730 = vmatprep.subr.mxu1 %v1606_v7  ;;  %1662 = vmatpush1.msra.mxu0 %v1539_v14  ;;  %v1520_v7 = vld [vmem:[#allocation8 + $0x1f8] sm:$0xff]  ;;  %v1582_v14 = vunpack.c.h.bf16 %v1487_v12  ;;  %v1581_v17 = vunpack.c.l.bf16 %v1487_v12 }
 0x11c   :  { %1731 = vmatpush1.msra.mxu1 %v1605_v9  ;;  %1663 = vmatprep.subr.mxu0 %v1538_v20  ;;  %v1648_v9 = vunpack.c.h.bf16 %v1520_v7  ;;  %v1647_v11 = vunpack.c.l.bf16 %v1520_v7  ;;  %v1486_v20 = vld [vmem:[#allocation8 + $0xe8] sm:$0xff]  ;;  %v1509_v7 = vld [vmem:[#allocation8 + $0x1a0] sm:$0xff] }
 0x11d   :  { %1732 = vmatprep.subr.mxu1 %v1604_v13  ;;  %1664 = vmatpush1.msra.mxu0 %v1537_v22  ;;  %v1519_v13 = vld [vmem:[#allocation8 + $0x1f0] sm:$0xff]  ;;  %v1580_v22 = vunpack.c.h.bf16 %v1486_v20  ;;  %v1579_v24 = vunpack.c.l.bf16 %v1486_v20 }
 0x11e   :  { %1733 = vmatpush1.msra.mxu1 %v1603_v15  ;;  %1665 = vmatprep.subr.mxu0 %v1536_v26  ;;  %v1646_v15 = vunpack.c.h.bf16 %v1519_v13  ;;  %v1645_v18 = vunpack.c.l.bf16 %v1519_v13  ;;  %v1485_v26 = vld [vmem:[#allocation8 + $0xe0] sm:$0xff] }
 0x11f   :  { %1734 = vmatprep.subr.mxu1 %v1602_v21  ;;  %1666 = vmatpush1.msra.mxu0 %v1535_v28  ;;  %v1518_v21 = vld [vmem:[#allocation8 + $0x1e8] sm:$0xff]  ;;  %v1578_v28 = vunpack.c.h.bf16 %v1485_v26  ;;  %v1577_v31 = vunpack.c.l.bf16 %v1485_v26 }
 0x120   :  { %1735 = vmatpush1.msra.mxu1 %v1601_v23  ;;  %1667 = vmatprep.subr.mxu0 %v1534_v33  ;;  %v1644_v23 = vunpack.c.h.bf16 %v1518_v21  ;;  %v1643_v25 = vunpack.c.l.bf16 %v1518_v21  ;;  %v1484_v33 = vld [vmem:[#allocation8 + $0xd8] sm:$0xff] }
 0x121   :  { %1736 = vmatprep.subr.mxu1 %v1600_v27  ;;  %1668 = vmatpush1.msra.mxu0 %v1533_v35  ;;  %v1517_v27 = vld [vmem:[#allocation8 + $0x1e0] sm:$0xff]  ;;  %v1576_v35 = vunpack.c.h.bf16 %v1484_v33  ;;  %v1575_v37 = vunpack.c.l.bf16 %v1484_v33 }
 0x122   :  { %1737 = vmatpush1.msra.mxu1 %v1599_v30  ;;  %1669 = vmatprep.subr.mxu0 %v1532_v39  ;;  %v1642_v30 = vunpack.c.h.bf16 %v1517_v27  ;;  %v1641_v32 = vunpack.c.l.bf16 %v1517_v27  ;;  %v1483_v39 = vld [vmem:[#allocation8 + $0xd0] sm:$0xff]  ;;  %v1506_v27 = vld [vmem:[#allocation8 + $0x188] sm:$0xff] }
 0x123   :  { %1738 = vmatprep.subr.mxu1 %v1598_v34  ;;  %1670 = vmatpush1.msra.mxu0 %v1531_v41  ;;  %v1516_v34 = vld [vmem:[#allocation8 + $0x1d8] sm:$0xff]  ;;  %v1574_v41 = vunpack.c.h.bf16 %v1483_v39  ;;  %v1573_v42 = vunpack.c.l.bf16 %v1483_v39  ;;  %v1619_v39 = vunpack.c.l.bf16 %v1506_v27 }
 0x124   :  { %1739 = vmatpush1.msra.mxu1 %v1597_v36  ;;  %1671 = vmatprep.subr.mxu0 %v1530_v44  ;;  %v1640_v36 = vunpack.c.h.bf16 %v1516_v34  ;;  %v1639_v38 = vunpack.c.l.bf16 %v1516_v34  ;;  %v1482_v44 = vld [vmem:[#allocation8 + $0xc8] sm:$0xff]  ;;  %v1505_v34 = vld [vmem:[#allocation8 + $0x180] sm:$0xff] }
 0x125   :  { %1740 = vmatprep.subr.mxu1 %v1596_v40  ;;  %1672 = vmatpush1.msra.mxu0 %v1529_v46  ;;  %v1515_v40 = vld [vmem:[#allocation8 + $0x1d0] sm:$0xff]  ;;  %v1572_v46 = vunpack.c.h.bf16 %v1482_v44  ;;  %v1571_v19 = vunpack.c.l.bf16 %v1482_v44 }
 0x126   :  { %1741 = vmatpush1.msra.mxu1 %v1595_v16  ;;  %1673 = vmatprep.subr.mxu0 %v1528_v29  ;;  %v1638_v16 = vunpack.c.h.bf16 %v1515_v40  ;;  %v1637_v43 = vunpack.c.l.bf16 %v1515_v40  ;;  %v1481_v29 = vld [vmem:[#allocation8 + $0xc0] sm:$0xff] }
 0x127   :  { %1742 = vmatprep.subr.mxu1 %v1594_v45  ;;  %1674 = vmatpush1.msra.mxu0 %v1527_v50  ;;  %v1514_v45 = vld [vmem:[#allocation8 + $0x1c8] sm:$0xff]  ;;  %v1570_v50 = vunpack.c.h.bf16 %v1481_v29  ;;  %v1569_v51 = vunpack.c.l.bf16 %v1481_v29 }
 0x128   :  { %1743 = vmatpush1.msra.mxu1 %v1593_v47  ;;  %1675 = vmatprep.subr.mxu0 %v1526_v52  ;;  %v1636_v47 = vunpack.c.h.bf16 %v1514_v45  ;;  %v1635_v48 = vunpack.c.l.bf16 %v1514_v45  ;;  %v1480_v52 = vld [vmem:[#allocation8 + $0xb8] sm:$0xff] }
 0x129   :  { %1744 = vmatprep.subr.mxu1 %v1592_v49  ;;  %1676 = vmatpush1.msra.mxu0 %v1525_v54  ;;  %v1513_v49 = vld [vmem:[#allocation8 + $0x1c0] sm:$0xff]  ;;  %v1568_v54 = vunpack.c.h.bf16 %v1480_v52  ;;  %v1567_v56 = vunpack.c.l.bf16 %v1480_v52 }
 0x12a   :  { %1745 = vmatpush1.msra.mxu1 %v1591_v1  ;;  %1677 = vmatprep.subr.mxu0 %v1524_v58  ;;  %v1634_v1 = vunpack.c.h.bf16 %v1513_v49  ;;  %v1633_v6 = vunpack.c.l.bf16 %v1513_v49  ;;  %v1479_v58 = vld [vmem:[#allocation8 + $0xb0] sm:$0xff] }
 0x12b   :  { %1746 = vmatprep.subr.mxu1 %v1590_v53  ;;  %1678 = vmatpush1.msra.mxu0 %v1523_v60  ;;  %v1512_v53 = vld [vmem:[#allocation8 + $0x1b8] sm:$0xff]  ;;  %v1566_v60 = vunpack.c.h.bf16 %v1479_v58  ;;  %v1565_v62 = vunpack.c.l.bf16 %v1479_v58 }
 0x12c   :  { %1747 = vmatpush1.msra.mxu1 %v1589_v55  ;;  %1679 = vmatprep.subr.mxu0 %v1522_v0  ;;  %v1632_v55 = vunpack.c.h.bf16 %v1512_v53  ;;  %v1631_v57 = vunpack.c.l.bf16 %v1512_v53  ;;  %v1478_v0 = vld [vmem:[#allocation8 + $0xa8] sm:$0xff] }
 0x12d   :  { %1748 = vmatprep.subr.mxu1 %v1588_v59  ;;  %1680 = vmatpush1.msra.mxu0 %v1521_v3  ;;  %v1511_v59 = vld [vmem:[#allocation8 + $0x1b0] sm:$0xff]  ;;  %v1477_v3 = vld [vmem:[#allocation8 + $0xa0] sm:$0xff]  ;;  %v1564_v5 = vunpack.c.h.bf16 %v1478_v0 }
 0x12e   :  { %1749 = vmatpush1.msra.mxu1 %v1587_v61  ;;  %1681 = vmatprep.subr.mxu0 %v1584_v8  ;;  %v1630_v61 = vunpack.c.h.bf16 %v1511_v59  ;;  %v1629_v63 = vunpack.c.l.bf16 %v1511_v59  ;;  %v1476_v8 = vld [vmem:[#allocation8 + $0x98] sm:$0xff]  ;;  %v1561_v12 = vunpack.c.l.bf16 %v1477_v3  ;;  %v1562_v13 = vunpack.c.h.bf16 %v1477_v3 }
 0x12f   :  { %1750 = vmatprep.subr.mxu1 %v1586_v2  ;;  %1682 = vmatpush2.msra.mxu0 %v1583_v10  ;;  %v1510_v2 = vld [vmem:[#allocation8 + $0x1a8] sm:$0xff]  ;;  %v1559_v20 = vunpack.c.l.bf16 %v1476_v8  ;;  %v1560_v21 = vunpack.c.h.bf16 %v1476_v8 }
 0x130   :  { %1751 = vmatpush1.msra.mxu1 %v1585_v4  ;;  %1683 = vmatprep.subr.mxu0 %v1582_v14  ;;  %v1563_v4 = vunpack.c.l.bf16 %v1478_v0  ;;  %v1627_v10 = vunpack.c.l.bf16 %v1510_v2  ;;  %v1475_v14 = vld [vmem:[#allocation8 + $0x90] sm:$0xff] }
 0x131   :  { %1752 = vmatprep.subr.mxu1 %v1648_v9  ;;  %1684 = vmatpush2.msra.mxu0 %v1581_v17  ;;  %v1508_v9 = vld [vmem:[#allocation8 + $0x198] sm:$0xff]  ;;  %v1626_v17 = vunpack.c.h.bf16 %v1509_v7  ;;  %v1558_v26 = vunpack.c.h.bf16 %v1475_v14 }
 0x132   :  { %1753 = vmatpush2.msra.mxu1 %v1647_v11  ;;  %1685 = vmatprep.subr.mxu0 %v1580_v22  ;;  %v1628_v11 = vunpack.c.h.bf16 %v1510_v2  ;;  %v1624_v22 = vunpack.c.h.bf16 %v1508_v9 }
 0x133   :  { %1754 = vmatprep.subr.mxu1 %v1646_v15  ;;  %1686 = vmatpush2.msra.mxu0 %v1579_v24  ;;  %v1625_v15 = vunpack.c.l.bf16 %v1509_v7 }
 0x134   :  { %1755 = vmatpush2.msra.mxu1 %v1645_v18  ;;  %1687 = vmatprep.subr.mxu0 %v1578_v28  ;;  %v1507_v18 = vld [vmem:[#allocation8 + $0x190] sm:$0xff]  ;;  %v1557_v28 = vunpack.c.l.bf16 %v1475_v14 }
 0x135   :  { %1756 = vmatprep.subr.mxu1 %v1644_v23  ;;  %1688 = vmatpush2.msra.mxu0 %v1577_v31  ;;  %v1474_v23 = vld [vmem:[#allocation8 + $0x88] sm:$0xff]  ;;  %v1473_v31 = vld [vmem:[#allocation8 + $0x80] sm:$0xff] }
 0x136   :  { %1757 = vmatpush2.msra.mxu1 %v1643_v25  ;;  %1689 = vmatprep.subr.mxu0 %v1576_v35  ;;  %v1623_v25 = vunpack.c.l.bf16 %v1508_v9  ;;  %v1556_v33 = vunpack.c.h.bf16 %v1474_v23  ;;  %v1555_v35 = vunpack.c.l.bf16 %v1474_v23  ;;  %v1554_v40 = vunpack.c.h.bf16 %v1473_v31 }
 0x137   :  { %1758 = vmatprep.subr.mxu1 %v1642_v30  ;;  %1690 = vmatpush2.msra.mxu0 %v1575_v37  ;;  %v1622_v30 = vunpack.c.h.bf16 %v1507_v18 }
 0x138   :  { %1759 = vmatpush2.msra.mxu1 %v1641_v32  ;;  %1691 = vmatprep.subr.mxu0 %v1574_v41  ;;  %v1621_v32 = vunpack.c.l.bf16 %v1507_v18  ;;  %v1553_v41 = vunpack.c.l.bf16 %v1473_v31 }
 0x139   :  { %1760 = vmatprep.subr.mxu1 %v1640_v36  ;;  %1692 = vmatpush2.msra.mxu0 %v1573_v42  ;;  %v1620_v36 = vunpack.c.h.bf16 %v1506_v27 }
 0x13a   :  { %1761 = vmatpush2.msra.mxu1 %v1639_v38  ;;  %1693 = vmatprep.subr.mxu0 %v1572_v46 }
 0x13b   :  { %1762 = vmatprep.subr.mxu1 %v1638_v16  ;;  %1694 = vmatpush2.msra.mxu0 %v1571_v19  ;;  %v1618_v16 = vunpack.c.h.bf16 %v1505_v34 }
 0x13c   :  { %1763 = vmatpush2.msra.mxu1 %v1637_v43  ;;  %1695 = vmatprep.subr.mxu0 %v1570_v50  ;;  %v1617_v43 = vunpack.c.l.bf16 %v1505_v34 }
 0x13d   :  { %1764 = vmatprep.subr.mxu1 %v1636_v47  ;;  %1696 = vmatpush2.msra.mxu0 %v1569_v51 }
 0x13e   :  { %1765 = vmatpush2.msra.mxu1 %v1635_v48  ;;  %1697 = vmatprep.subr.mxu0 %v1568_v54 }
 0x13f   :  { %1766 = vmatprep.subr.mxu1 %v1634_v1  ;;  %1698 = vmatpush2.msra.mxu0 %v1567_v56 }
 0x140   :  { %1767 = vmatpush2.msra.mxu1 %v1633_v6  ;;  %1699 = vmatprep.subr.mxu0 %v1566_v60 }
 0x141   :  { %1768 = vmatprep.subr.mxu1 %v1632_v55  ;;  %1700 = vmatpush2.msra.mxu0 %v1565_v62 }
 0x142   :  { %1769 = vmatpush2.msra.mxu1 %v1631_v57  ;;  %1701 = vmatprep.subr.mxu0 %v1564_v5 }
 0x143   :  { %1770 = vmatprep.subr.mxu1 %v1630_v61  ;;  %1702 = vmatpush2.msra.mxu0 %v1563_v4 }
 0x144   :  { %1771 = vmatpush2.msra.mxu1 %v1629_v63  ;;  %v762_v24 = vpop.f32.mrf.mxu0  ;;  %1703 = vmatprep.subr.mxu0 %v1562_v13 }
 0x145   :  { %1772 = vmatprep.subr.mxu1 %v1628_v11  ;;  %1704 = vmatpush2.msra.mxu0 %v1561_v12  ;;  %v833_v37 = vpop.f32.mrf.mxu1 }
 0x146   :  { %1773 = vmatpush2.msra.mxu1 %v1627_v10  ;;  %1705 = vmatprep.subr.mxu0 %v1560_v21  ;;  %v764_v38 = vpop.f32.mrf.mxu0  ;;  %v834_v19 = vadd.f32 %v833_v37, %v762_v24 }
 0x147   :  { %1774 = vmatprep.subr.mxu1 %v1626_v17  ;;  %1706 = vmatpush2.msra.mxu0 %v1559_v20  ;;  %v835_v44 = vpop.f32.mrf.mxu1 }
 0x148   :  { %1775 = vmatpush2.msra.mxu1 %v1625_v15  ;;  %1707 = vmatprep.subr.mxu0 %v1558_v26  ;;  %v836_v46 = vadd.f32 %v835_v44, %v764_v38 }
 0x149   :  { %1776 = vmatprep.subr.mxu1 %v1624_v22  ;;  %1708 = vmatpush2.msra.mxu0 %v1557_v28 }
 0x14a   :  { %1777 = vmatpush2.msra.mxu1 %v1623_v25  ;;  %1709 = vmatprep.subr.mxu0 %v1556_v33  ;;  %v975_v47 = vpop.f32.mrf.mxu1 }
 0x14b   :  { %1778 = vmatprep.subr.mxu1 %v1622_v30  ;;  %1710 = vmatpush2.msra.mxu0 %v1555_v35 }
 0x14c   :  { %1779 = vmatpush2.msra.mxu1 %v1621_v32  ;;  %1711 = vmatprep.subr.mxu0 %v1554_v40  ;;  %v977_v49 = vpop.f32.mrf.mxu1 }
 0x14d   :  { %1780 = vmatprep.subr.mxu1 %v1620_v36  ;;  %1712 = vmatpush2.msra.mxu0 %v1553_v41 }
 0x14e   :  { %1781 = vmatpush2.msra.mxu1 %v1619_v39 }
 0x14f   :  { %1782 = vmatprep.subr.mxu1 %v1618_v16 }
 0x150   :  { %1783 = vmatpush2.msra.mxu1 %v1617_v43 }
 0x187   :  { %v904_v42 = vpop.f32.mrf.mxu0 }
 0x188   :  { %v905_v29 = vadd.f32 %v904_v42, %v834_v19 }
 0x189   :  { %v906_v45 = vpop.f32.mrf.mxu0 }
 0x18a   :  { %v907_v48 = vadd.f32 %v906_v45, %v836_v46  ;;  %v2441_v1 = vadd.f32 %v975_v47, %v905_v29 }
 0x18c   :  { %v2439_v50 = vadd.f32 %v977_v49, %v907_v48  ;;  %v1266_v6 = vrot.slane %v2441_v1, 4  ;;  %v1046_v62 = vpop.f32.mrf.mxu1 }
 0x18e   :  { %v1272_v51 = vrot.slane %v2439_v50, 4  ;;  %v1267_v53 = vadd.f32 %v1266_v6, %v2441_v1  ;;  %v1048_v3 = vpop.f32.mrf.mxu1 }
 0x190   :  { %v1273_v52 = vadd.f32 %v1272_v51, %v2439_v50  ;;  %v1268_v55 = vrot.slane %v1267_v53, 2 }
 0x192   :  { %v1274_v54 = vrot.slane %v1273_v52, 2  ;;  %v1269_v57 = vadd.f32 %v1268_v55, %v1267_v53 }
 0x194   :  { %v1275_v56 = vadd.f32 %v1274_v54, %v1273_v52  ;;  %v1270_v59 = vrot.slane %v1269_v57, 1 }
 0x196   :  { %v1276_v58 = vrot.slane %v1275_v56, 1  ;;  %v1271_v61 = vadd.f32 %v1270_v59, %v1269_v57 }
 0x198   :  { %v1277_v60 = vadd.f32 %v1276_v58, %v1275_v56  ;;  %v2449_v2 = vmul.f32 0.125, %v1271_v61 }
 0x19a   :  { %v2447_v63 = vmul.f32 0.125, %v1277_v60  ;;  %v1295_v8 = vsub.f32 %v2441_v1, %v2449_v2 }
 0x19c   :  { %v1296_v4 = vsub.f32 %v2439_v50, %v2447_v63  ;;  %v1299_v15 = vmul.f32 %v1295_v8, %v1295_v8 }
 0x19e   :  { %v1300_v11 = vmul.f32 %v1296_v4, %v1296_v4  ;;  %v1303_v24 = vrot.slane %v1299_v15, 4 }
 0x1a0   :  { %v1309_v21 = vrot.slane %v1300_v11, 4  ;;  %v1304_v31 = vadd.f32 %v1303_v24, %v1299_v15 }
 0x1a2   :  { %v1310_v27 = vadd.f32 %v1309_v21, %v1300_v11  ;;  %v1305_v37 = vrot.slane %v1304_v31, 2 }
 0x1a4   :  { %v1311_v34 = vrot.slane %v1310_v27, 2  ;;  %v1306_v42 = vadd.f32 %v1305_v37, %v1304_v31 }
 0x1a6   :  { %v1312_v40 = vadd.f32 %v1311_v34, %v1310_v27  ;;  %v1307_v19 = vrot.slane %v1306_v42, 1 }
 0x1a8   :  { %v1313_v45 = vrot.slane %v1312_v40, 1  ;;  %v1308_v52 = vadd.f32 %v1307_v19, %v1306_v42 }
 0x1aa   :  { %v1314_v49 = vadd.f32 %v1313_v45, %v1312_v40  ;;  %v1327_v58 = vmul.f32 0.125, %v1308_v52 }
 0x1ac   :  { %v1328_v55 = vmul.f32 0.125, %v1314_v49  ;;  %v1265_v49 = vld [vmem:[%s2513_s3] sm:$0xf] }
 0x1ae   :  { %v1332_v61 = vadd.f32 1e-05, %v1328_v55 }
 0x1b0   :  { %2193 = vrsqrt.f32 %v1332_v61 }
 0x1bd   :  { %v2194_v15 = vpop.eup %2193 }
 0x1c9   :  { %v1117_v0 = vpop.f32.mrf.mxu0 }
 0x1ca   :  { %v1118_v9 = vadd.f32 %v1117_v0, %v1046_v62 }
 0x1cb   :  { %v1119_v5 = vpop.f32.mrf.mxu0 }
 0x1cc   :  { %v1120_v12 = vadd.f32 %v1119_v5, %v1048_v3  ;;  %v1331_v3 = vadd.f32 1e-05, %v1327_v58 }
 0x1cd   :  { %v1188_v7 = vpop.f32.mrf.mxu1 }
 0x1ce   :  { %v1189_v13 = vadd.f32 %v1188_v7, %v1118_v9  ;;  %2195 = vrsqrt.f32 %v1331_v3 }
 0x1cf   :  { %v1190_v10 = vpop.f32.mrf.mxu1 }
 0x1d0   :  { %v1191_v17 = vadd.f32 %v1190_v10, %v1120_v12  ;;  %v2352_v10 = vmov 1966171168   ;;  %v1348_v12 = vlaneseq }
 0x1d1   :  { %v1259_v14 = vpop.f32.mrf.mxu1  ;;  %v1346_v11 = vunpack.c.l.s4 %v2352_v10  ;;  %v2141_v10 = vld [vmem:[#allocation10 + $0x68] sm:$0xff]  }
 0x1d2   :  { %v2455_v18 = vadd.f32 %v1259_v14, %v1189_v13  ;;  %v1349_v14 = vshrl.u32 %v1348_v12, 7  ;;  %v2133_v12 = vld [vmem:[#allocation10 + $0x28] sm:$0xff]  }
 0x1d3   :  { %v1261_v20 = vpop.f32.mrf.mxu1  ;;  %v1347_v13 = vunpack.c.0.s8 %v1346_v11 }
 0x1d4   :  { %v1278_v22 = vrot.slane %v2455_v18, 4  ;;  %v2458_v23 = vadd.f32 %v1261_v20, %v1191_v17  ;;  %v1380_v31 = vsub.s32 2, %v1349_v14  ;;  %v2470_v34 = vsub.s32 0, %v1349_v14 }
 0x1d6   :  { %v1279_v25 = vadd.f32 %v1278_v22, %v2455_v18  ;;  %v1284_v26 = vrot.slane %v2458_v23, 4  ;;  %v2465_v22 = vsub.s32 %v1347_v13, %v1349_v14 }
 0x1d8   :  { %v1280_v28 = vrot.slane %v1279_v25, 2  ;;  %v1285_v30 = vadd.f32 %v1284_v26, %v2458_v23 }
 0x1da   :  { %v1281_v32 = vadd.f32 %v1280_v28, %v1279_v25  ;;  %v1286_v33 = vrot.slane %v1285_v30, 2 }
 0x1db   :  { %v2196_v17 = vpop.eup %2195 }
 0x1dc   :  { %v1282_v35 = vrot.slane %v1281_v32, 1  ;;  %v1287_v36 = vadd.f32 %v1286_v33, %v1285_v30  ;;  %v1343_v21 = vcombine.low %v2196_v17, %v2194_v15  ;;  %v1264_v30 = vld [vmem:[#allocation7] sm:$0xf]  ;;  %v1384_v33 = vsub.s32 3, %v1349_v14  ;;  %v2140_v17 = vld [vmem:[#allocation10 + $0x60] sm:$0xff]  }
 0x1dd   :  { %v2088_v15 = vunpack.c.h.bf16 %v2133_v12 }
 0x1de   :  { %v1283_v38 = vadd.f32 %v1282_v35, %v1281_v32  ;;  %v1288_v39 = vrot.slane %v1287_v36, 1  ;;  %v1351_v26 = vrot.slane %v1343_v21, %v2465_v22  ;;  %v2472_v35 = vsub.s32 1, %v1349_v14  ;;  %v2132_v21 = vld [vmem:[#allocation10 + $0x20] sm:$0xff]  }
 0x1df   :  { %v2120_v14 = vunpack.c.h.bf16 %v2141_v10 }
 0x1e0   :  { %v1293_v41 = vmul.f32 0.125, %v1283_v38  ;;  %v1289_v16 = vadd.f32 %v1288_v39, %v1287_v36 }
 0x1e2   :  { %v1297_v43 = vsub.f32 %v2455_v18, %v1293_v41  ;;  %v1294_v44 = vmul.f32 0.125, %v1289_v16 }
 0x1e4   :  { %v1301_v46 = vmul.f32 %v1297_v43, %v1297_v43  ;;  %v1298_v47 = vsub.f32 %v2458_v23, %v1294_v44 }
 0x1e6   :  { %v1315_v48 = vrot.slane %v1301_v46, 4  ;;  %v1302_v29 = vmul.f32 %v1298_v47, %v1298_v47 }
 0x1e8   :  { %v1316_v51 = vadd.f32 %v1315_v48, %v1301_v46  ;;  %v1321_v6 = vrot.slane %v1302_v29, 4 }
 0x1ea   :  { %v1317_v53 = vrot.slane %v1316_v51, 2  ;;  %v1322_v54 = vadd.f32 %v1321_v6, %v1302_v29 }
 0x1ec   :  { %v1318_v56 = vadd.f32 %v1317_v53, %v1316_v51  ;;  %v1323_v57 = vrot.slane %v1322_v54, 2 }
 0x1ee   :  { %v1319_v59 = vrot.slane %v1318_v56, 1  ;;  %v1324_v60 = vadd.f32 %v1323_v57, %v1322_v54 }
 0x1f0   :  { %v1320_v62 = vadd.f32 %v1319_v59, %v1318_v56  ;;  %v1325_v0 = vrot.slane %v1324_v60, 1 }
 0x1f2   :  { %v1329_v4 = vmul.f32 0.125, %v1320_v62  ;;  %v1326_v5 = vadd.f32 %v1325_v0, %v1324_v60 }
 0x1f4   :  { %v1333_v7 = vadd.f32 1e-05, %v1329_v4  ;;  %v1330_v8 = vmul.f32 0.125, %v1326_v5  ;;  %v2134_v5 = vld [vmem:[#allocation10 + $0x30] sm:$0xff]  }
 0x1f5   :  { %v2091_v13 = vunpack.c.l.bf16 %v2134_v5 }
 0x1f6   :  { %v1334_v9 = vadd.f32 1e-05, %v1330_v8  ;;  %2197 = vrsqrt.f32 %v1333_v7 }
 0x1f8   :  { %2199 = vrsqrt.f32 %v1334_v9  ;;  %v2092_v9 = vunpack.c.h.bf16 %v2134_v5 }
 0x203   :  { %v2198_v20 = vpop.eup %2197 }
 0x205   :  { %v2200_v24 = vpop.eup %2199 }
 0x206   :  { %v1344_v25 = vcombine.low %v2198_v20, %v2200_v24  ;;  %v2119_v20 = vunpack.c.l.bf16 %v2141_v10  ;;  %v2087_v24 = vunpack.c.l.bf16 %v2133_v12 }
 0x208   :  { %v1358_v27 = vrot.slane %v1344_v25, %v2465_v22  ;;  %v2116_v25 = vunpack.c.h.bf16 %v2140_v17 }
 0x20a   :  { %v1359_v28 = vcombine.low %v1351_v26, %v1358_v27  ;;  %v2084_v26 = vunpack.c.h.bf16 %v2132_v21  ;;  %v2139_v27 = vld [vmem:[#allocation10 + $0x58] sm:$0xff]  }
 0x20c   :  { %v1366_v32 = vrot.slane %v1359_v28, %v2465_v22  ;;  %v2115_v28 = vunpack.c.l.bf16 %v2140_v17 }
 0x20e   :  { %v1368_v36 = vmul.f32 %v1366_v32, %v1264_v30  ;;  %v2131_v30 = vld [vmem:[#allocation10 + $0x18] sm:$0xff]   ;;  %v2112_v32 = vunpack.c.h.bf16 %v2139_v27 }
 0x210   :  { %v1381_v37 = vrot.slane %v1368_v36, %v1380_v31  ;;  %v1385_v38 = vrot.slane %v1368_v36, %v1384_v33  ;;  %v1373_v39 = vrot.slane %v1368_v36, %v2470_v34  ;;  %v1377_v40 = vrot.slane %v1368_v36, %v2472_v35  ;;  %v2138_v36 = vld [vmem:[#allocation10 + $0x50] sm:$0xff]  }
 0x212   :  { %v1392_v16 = vmul.f32 %v1381_v37, %v1293_v41  ;;  %v1393_v42 = vmul.f32 %v1385_v38, %v1294_v44  ;;  %v1390_v43 = vmul.f32 %v1373_v39, %v2449_v2  ;;  %v1391_v45 = vmul.f32 %v1377_v40, %v2447_v63 }
 0x213   :  { %v1425_v41 = vmul.f32 %v1377_v40, %v2439_v50  ;;  %v1427_v2 = vmul.f32 %v1385_v38, %v2458_v23  ;;  %v1424_v63 = vmul.f32 %v1373_v39, %v2441_v1  ;;  %v1426_v44 = vmul.f32 %v1381_v37, %v2455_v18  ;;  %v2143_v1 = vld [vmem:[#allocation10 + $0x78] sm:$0xff]   ;;  %v2142_v23 = vld [vmem:[#allocation10 + $0x70] sm:$0xff]  }
 0x214   :  { %v1399_v46 = vcombine.low %v1392_v16, %v1393_v42  ;;  %v1398_v47 = vcombine.low %v1390_v43, %v1391_v45  ;;  %v2135_v18 = vld [vmem:[#allocation10 + $0x38] sm:$0xff]   ;;  %v2128_v0 = vunpack.c.h.bf16 %v2143_v1  ;;  %v2127_v4 = vunpack.c.l.bf16 %v2143_v1  ;;  %v2130_v38 = vld [vmem:[#allocation10 + $0x10] sm:$0xff]   ;;  %v2137_v42 = vld [vmem:[#allocation10 + $0x48] sm:$0xff]  }
 0x215   :  { %v2096_v3 = vunpack.c.h.bf16 %v2135_v18  ;;  %v2095_v7 = vunpack.c.l.bf16 %v2135_v18  ;;  %v2124_v8 = vunpack.c.h.bf16 %v2142_v23  ;;  %v2123_v11 = vunpack.c.l.bf16 %v2142_v23  ;;  %v2129_v45 = vld [vmem:[#allocation10 + $0x8] sm:$0xff]  }
 0x216   :  { %v1413_v19 = vrot.slane %v1399_v46, %v2465_v22  ;;  %v1406_v48 = vrot.slane %v1398_v47, %v2465_v22  ;;  %2144 = vmatprep.subr.mxu0 %v2128_v0  ;;  %v2111_v37 = vunpack.c.l.bf16 %v2139_v27  ;;  %v2079_v39 = vunpack.c.l.bf16 %v2131_v30 }
 0x217   :  { %v2108_v40 = vunpack.c.h.bf16 %v2138_v36  ;;  %v2076_v16 = vunpack.c.h.bf16 %v2130_v38  ;;  %v2107_v43 = vunpack.c.l.bf16 %v2138_v36  ;;  %v2075_v46 = vunpack.c.l.bf16 %v2130_v38 }
 0x218   :  { %v1414_v29 = vcombine.low %v1406_v48, %v1413_v19  ;;  %v2104_v47 = vunpack.c.h.bf16 %v2137_v42  ;;  %v2072_v19 = vunpack.c.h.bf16 %v2129_v45  ;;  %v2136_v48 = vld [vmem:[#allocation10 + $0x40] sm:$0xff]  }
 0x21a   :  { %v1421_v51 = vrot.slane %v1414_v29, %v2465_v22  ;;  %v2103_v29 = vunpack.c.l.bf16 %v2137_v42 }
 0x21c   :  { %v1423_v6 = vsub.f32 %v1265_v49, %v1421_v51  ;;  %v2066_v49 = vld [vmem:[#allocation10] sm:$0xff]   ;;  %v2071_v51 = vunpack.c.l.bf16 %v2129_v45 }
 0x21e   :  { %v1436_v52 = vrot.slane %v1423_v6, %v2472_v35  ;;  %v1444_v53 = vrot.slane %v1423_v6, %v1384_v33  ;;  %v1432_v54 = vrot.slane %v1423_v6, %v2470_v34  ;;  %v1440_v55 = vrot.slane %v1423_v6, %v1380_v31 }
 0x21f   :  { %v2083_v31 = vunpack.c.l.bf16 %v2132_v21  ;;  %v2080_v33 = vunpack.c.h.bf16 %v2131_v30  ;;  %v2100_v6 = vunpack.c.h.bf16 %v2136_v48 }
 0x220   :  { %v1450_v56 = vadd.f32 %v1436_v52, %v1425_v41  ;;  %v1452_v57 = vadd.f32 %v1444_v53, %v1427_v2  ;;  %v1449_v58 = vadd.f32 %v1432_v54, %v1424_v63  ;;  %v1451_v59 = vadd.f32 %v1440_v55, %v1426_v44 }
 0x221   :  { %v2068_v41 = vunpack.c.h.bf16 %v2066_v49  ;;  %v2099_v2 = vunpack.c.l.bf16 %v2136_v48  ;;  %v2067_v63 = vunpack.c.l.bf16 %v2066_v49  ;;  %v1792_v48 = vld [vmem:[%s2516_s6] sm:$0x3]  ;;  %s2353_s6 = smov [#allocation11]  }
 0x222   :  { %v1454_v60 = vmax.f32 %v1450_v56, 0.0  ;;  %v1456_v61 = vmax.f32 %v1452_v57, 0.0  ;;  %v1453_v62 = vmax.f32 %v1449_v58, 0.0  ;;  %v1455_v50 = vmax.f32 %v1451_v59, 0.0  ;;  %s2051_s20 = sshll.u32 %s2353_s6, 4  ;;  %s2052_s20 = int_to_ptr.vmem [resolvable:$true] %s2051_s20 }
 0x223   :  { %s2312_s21 = scalar_lea.vmem %s2052_s20, 128  ;;  %p2317_p12 = scmp.lt.s32.totalorder %s2052_s20, %s2052_s20 }
 0x224   :  { %1713 = vmatprep.mubr.f32.mxu0 %v1454_v60  ;;  %1784 = vmatprep.mubr.f32.mxu1 %v1456_v61  ;;  %p2313_p11 = scmp.ne.s32.totalorder %s2052_s20, %s2312_s21  ;;  %p2318_p13 = scmp.lt.s32.totalorder %s2312_s21, %s2312_s21 }
 0x225   :  { %1714 = vmatmul.mubr.f32.vlgmr.msra.gmra.mxu0 %v1453_v62  ;;  %1785 = vmatmul.mubr.f32.vlgmr.msra.gmra.mxu1 %v1455_v50 }
 0x226   :  { %2145 = vmatpush3.msra.mxu0 %v2096_v3  ;;  %p2319_p0 = por %p2318_p13, %p2317_p12 }
 0x227   :  { %2146 = vmatprep.subr.mxu0 %v2127_v4 }
 0x228   :  { %2147 = vmatpush3.msra.mxu0 %v2095_v7  ;;  %p2320_p1 = pnand %p2319_p0, %p2313_p11 }
 0x229   :  { %2148 = vmatprep.subr.mxu0 %v2124_v8 }
 0x22a   :  { %2149 = vmatpush3.msra.mxu0 %v2092_v9 }
 0x22b   :  { %2150 = vmatprep.subr.mxu0 %v2123_v11 }
 0x22c   :  { %2151 = vmatpush3.msra.mxu0 %v2091_v13 }
 0x22d   :  { %2152 = vmatprep.subr.mxu0 %v2120_v14 }
 0x22e   :  { %2153 = vmatpush3.msra.mxu0 %v2088_v15 }
 0x22f   :  { %2154 = vmatprep.subr.mxu0 %v2119_v20 }
 0x230   :  { %2155 = vmatpush3.msra.mxu0 %v2087_v24 }
 0x231   :  { %2156 = vmatprep.subr.mxu0 %v2116_v25 }
 0x232   :  { %2157 = vmatpush3.msra.mxu0 %v2084_v26 }
 0x233   :  { %2158 = vmatprep.subr.mxu0 %v2115_v28 }
 0x234   :  { %2159 = vmatpush3.msra.mxu0 %v2083_v31 }
 0x235   :  { %2160 = vmatprep.subr.mxu0 %v2112_v32 }
 0x236   :  { %2161 = vmatpush3.msra.mxu0 %v2080_v33 }
 0x237   :  { %2162 = vmatprep.subr.mxu0 %v2111_v37 }
 0x238   :  { %2163 = vmatpush3.msra.mxu0 %v2079_v39  ;;  %v1791_v39 = vld [vmem:[%s2515_s5] sm:$0x3] }
 0x239   :  { %2164 = vmatprep.subr.mxu0 %v2108_v40 }
 0x23a   :  { %2165 = vmatpush3.msra.mxu0 %v2076_v16 }
 0x23b   :  { %2166 = vmatprep.subr.mxu0 %v2107_v43 }
 0x23c   :  { %2167 = vmatpush3.msra.mxu0 %v2075_v46 }
 0x23d   :  { %2168 = vmatprep.subr.mxu0 %v2104_v47 }
 0x23e   :  { %2169 = vmatpush3.msra.mxu0 %v2072_v19 }
 0x23f   :  { %2170 = vmatprep.subr.mxu0 %v2103_v29 }
 0x240   :  { %2171 = vmatpush3.msra.mxu0 %v2071_v51 }
 0x241   :  { %2172 = vmatprep.subr.mxu0 %v2100_v6 }
 0x242   :  { %2173 = vmatpush3.msra.mxu0 %v2068_v41 }
 0x243   :  { %2174 = vmatprep.subr.mxu0 %v2099_v2 }
 0x244   :  { %2175 = vmatpush3.msra.mxu0 %v2067_v63 }
 0x2e5   :  { %v1715_v44 = vpop.f32.mrf.mxu0  ;;  %v1786_v52 = vpop.f32.mrf.mxu1 }
 0x2e6   :  { %v1787_v53 = vadd.f32 %v1786_v52, %v1715_v44 }
 0x2e7   :  { %v1717_v54 = vpop.f32.mrf.mxu0  ;;  %v1788_v55 = vpop.f32.mrf.mxu1 }
 0x2e8   :  { %v1793_v56 = vrot.slane %v1787_v53, 4  ;;  %v1789_v57 = vadd.f32 %v1788_v55, %v1717_v54 }
 0x2ea   :  { %v1794_v58 = vadd.f32 %v1793_v56, %v1787_v53  ;;  %v1799_v59 = vrot.slane %v1789_v57, 4  ;;  %v2064_v56 = vld [vmem:[%s2518_s8] ss:$0 sm:$0xff] }
 0x2ec   :  { %v1795_v60 = vrot.slane %v1794_v58, 2  ;;  %v1800_v61 = vadd.f32 %v1799_v59, %v1789_v57 }
 0x2ee   :  { %v1796_v62 = vadd.f32 %v1795_v60, %v1794_v58  ;;  %v1801_v50 = vrot.slane %v1800_v61, 2 }
 0x2f0   :  { %v1797_v1 = vrot.slane %v1796_v62, 1  ;;  %v1802_v18 = vadd.f32 %v1801_v50, %v1800_v61 }
 0x2f2   :  { %v1798_v23 = vadd.f32 %v1797_v1, %v1796_v62  ;;  %v1803_v0 = vrot.slane %v1802_v18, 1 }
 0x2f4   :  { %v1805_v3 = vmul.f32 0.125, %v1798_v23  ;;  %v1804_v4 = vadd.f32 %v1803_v0, %v1802_v18 }
 0x2f6   :  { %v1807_v5 = vsub.f32 %v1787_v53, %v1805_v3  ;;  %v1806_v7 = vmul.f32 0.125, %v1804_v4 }
 0x2f8   :  { %v1809_v8 = vmul.f32 %v1807_v5, %v1807_v5  ;;  %v1808_v9 = vsub.f32 %v1789_v57, %v1806_v7 }
 0x2fa   :  { %v1811_v10 = vrot.slane %v1809_v8, 4  ;;  %v1810_v11 = vmul.f32 %v1808_v9, %v1808_v9 }
 0x2fc   :  { %v1812_v12 = vadd.f32 %v1811_v10, %v1809_v8  ;;  %v1817_v13 = vrot.slane %v1810_v11, 4 }
 0x2fe   :  { %v1813_v14 = vrot.slane %v1812_v12, 2  ;;  %v1818_v15 = vadd.f32 %v1817_v13, %v1810_v11 }
 0x300   :  { %v1814_v17 = vadd.f32 %v1813_v14, %v1812_v12  ;;  %v1819_v20 = vrot.slane %v1818_v15, 2 }
 0x302   :  { %v1815_v21 = vrot.slane %v1814_v17, 1  ;;  %v1820_v24 = vadd.f32 %v1819_v20, %v1818_v15 }
 0x304   :  { %v1816_v25 = vadd.f32 %v1815_v21, %v1814_v17  ;;  %v1821_v26 = vrot.slane %v1820_v24, 1 }
 0x306   :  { %v1823_v27 = vmul.f32 0.125, %v1816_v25  ;;  %v1822_v28 = vadd.f32 %v1821_v26, %v1820_v24 }
 0x308   :  { %v1825_v30 = vadd.f32 1e-05, %v1823_v27  ;;  %v1824_v31 = vmul.f32 0.125, %v1822_v28 }
 0x30a   :  { %v1826_v32 = vadd.f32 1e-05, %v1824_v31  ;;  %2201 = vrsqrt.f32 %v1825_v30 }
 0x30c   :  { %2203 = vrsqrt.f32 %v1826_v32 }
 0x317   :  { %v2202_v33 = vpop.eup %2201 }
 0x319   :  { %v2204_v36 = vpop.eup %2203 }
 0x31a   :  { %v1831_v37 = vcombine.low %v2202_v33, %v2204_v36 }
 0x31c   :  { %v1838_v38 = vrot.slane %v1831_v37, %v2465_v22 }
 0x31e   :  { %v1845_v40 = vrot.slane %v1838_v38, %v2465_v22 }
 0x320   :  { %v1847_v16 = vmul.f32 %v1845_v40, %v1791_v39 }
 0x322   :  { %v1852_v42 = vrot.slane %v1847_v16, %v2470_v34  ;;  %v1856_v43 = vrot.slane %v1847_v16, %v2472_v35 }
 0x324   :  { %v1859_v45 = vmul.f32 %v1852_v42, %v1805_v3  ;;  %v1860_v46 = vmul.f32 %v1856_v43, %v1806_v7  ;;  %v1881_v51 = vmul.f32 %v1856_v43, %v1789_v57  ;;  %v1880_v41 = vmul.f32 %v1852_v42, %v1787_v53 }
 0x326   :  { %v1863_v47 = vcombine.low %v1859_v45, %v1860_v46 }
 0x328   :  { %v1870_v19 = vrot.slane %v1863_v47, %v2465_v22 }
 0x32a   :  { %v1877_v29 = vrot.slane %v1870_v19, %v2465_v22 }
 0x32c   :  { %v1879_v49 = vsub.f32 %v1792_v48, %v1877_v29 }
 0x32e   :  { %v1890_v6 = vrot.slane %v1879_v49, %v2472_v35  ;;  %v1886_v2 = vrot.slane %v1879_v49, %v2470_v34 }
 0x330   :  { %v1894_v63 = vadd.f32 %v1890_v6, %v1881_v51  ;;  %v1893_v44 = vadd.f32 %v1886_v2, %v1880_v41 }
 0x332   :  { %v1896_v52 = vmax.f32 %v1894_v63, 0.0  ;;  %v1895_v54 = vmax.f32 %v1893_v44, 0.0 }
 0x334   :  { %2032 = vmatprep.mubr.f32.mxu0 %v1896_v52 }
 0x335   :  { %2033 = vmatmul.mubr.f32.vlgmr.msra.gmra.mxu0 %v1895_v54 }
 0x3f5   :  { %v2176_v55 = vpop.f32.mrf.mxu0 }
 0x3f7   :  { %v2177_v58 = vpop.f32.mrf.mxu0 }
 0x3f8   :  { %v2178_v22 = vadd.f32 %v2177_v58, %v2176_v55 }
 0x3fa   :  { %v2035_v59 = vadd.f32 %v2178_v22, %v2064_v56 }
 0x3fc   :  { %v2038_v57 = vsub.f32 0.0, %v2035_v59 }
 0x3fe   :  { %v2039_v60 = vmul.f32 1.442695, %v2038_v57 }
 0x400   :  { %2205 = vpow2.f32 %v2039_v60 }
 0x40d   :  { %v2206_v35 = vpop.eup %2205 }
 0x40e   :  { %v2041_v53 = vadd.f32 1.0, %v2206_v35 }
 0x410   :  { %2207 = vrcp.f32 %v2041_v53 }
 0x41d   :  { %v2208_v34 = vpop.eup %2207 }
 0x41e   :  { %2044 = vst [vmem:[#allocation11] sm:$0xff] %v2208_v34 }
 0x41f   :  { %2323 = shalt.err (!%p2320_p1)
}
 0x420   :  { %2054 = dma.vmem_to_hbm [thread:$0]  %s2052_s20, 128, %s2519_s9, [#allocation4]  }
 0x421   :  { %2338 = dma.done.wait [#allocation4], 128  }
 0x422   :  { %2339 = vsyncadd [#allocation4], 4294967168 }
 0x423   :  { %2058 = vsyncpa [#allocation3], 1 }
 0x424   :  { %2059 = vsyncpa [#allocation6], 1 }
 0x425   :  { %2060 = vsyncpa [#allocation9], 1 }
 0x426   :  { %2061 = vsyncpa [#allocation4], 1 }

</bundles_post_ra>
